<compile_context>
chip_gen: v5e
topology: v5e:2x2
jax: 0.10.0
libtpu: 0.0.40
codegen_flags: <defaults>
</compile_context>

<pallas_src>
import jax
import jax.numpy as jnp
from jax.experimental import pallas as pl
from jax.experimental.pallas import tpu as pltpu


def _round_up(x, m):
    return ((x + m - 1) // m) * m


def _mlp_l2norm_kernel(x_ref, w1_ref, b1_ref, w2_ref, b2_ref, o_ref):
    # x_ref:  (TM, Cp)      bf16 (or f32)
    # w1_ref: (Cp, NCp)     bf16 (or f32)
    # b1_ref: (1, NCp)      f32
    # w2_ref: (NCp, NCp)    bf16 (or f32)
    # b2_ref: (1, NCp)      f32
    # o_ref:  (TM, NCp)     f32
    h = jnp.dot(x_ref[...], w1_ref[...], preferred_element_type=jnp.float32)
    h = jnp.maximum(h + b1_ref[...], 0.0)                 # bias + ReLU in f32
    h = h.astype(w2_ref.dtype)                            # feed MXU in weight dtype
    y = jnp.dot(h, w2_ref[...], preferred_element_type=jnp.float32) + b2_ref[...]
    # Normalize(power=2): y / (||y||_2 + 1e-7), norm over the feature dim (f32).
    norm = jnp.sqrt(jnp.sum(y * y, axis=-1, keepdims=True))
    inv = pl.reciprocal(norm + 1e-7, approx=False)        # EUP, not a VPU divide
    o_ref[...] = (y * inv).astype(o_ref.dtype)


def mlp_l2norm(x, w1, b1, w2, b2, *, tile_m=None, use_bf16=True):
    """Linear->ReLU->Linear->L2norm on x of shape (N, C_in) via a single Pallas kernel."""
    n, c_in = x.shape
    nc = w1.shape[1]

    # Lane-dense / MXU-aligned padded sizes.
    c_pad = _round_up(c_in, 128)
    nc_pad = _round_up(nc, 128)
    if tile_m is None:
        # One (or few) big tiles; 256/512 are multiples of 128 (v5e MXU) and 256 (v6e/v7x MXU),
        # and of 16 (bf16 sublane packing). Real CUT configs (N<=1024) -> 1-2 grid steps.
        tile_m = min(_round_up(max(n, 1), 256), 512)
    n_pad = _round_up(n, tile_m)

    mxu_dtype = jnp.bfloat16 if use_bf16 else jnp.float32
    x_p = jnp.pad(x.astype(mxu_dtype), ((0, n_pad - n), (0, c_pad - c_in)))
    w1_p = jnp.pad(w1.astype(mxu_dtype), ((0, c_pad - c_in), (0, nc_pad - nc)))
    w2_p = jnp.pad(w2.astype(mxu_dtype), ((0, nc_pad - nc), (0, nc_pad - nc)))
    b1_p = jnp.pad(b1.astype(jnp.float32).reshape(1, nc), ((0, 0), (0, nc_pad - nc)))
    b2_p = jnp.pad(b2.astype(jnp.float32).reshape(1, nc), ((0, 0), (0, nc_pad - nc)))

    itemsize = jnp.dtype(mxu_dtype).itemsize
    cost = pl.CostEstimate(
        flops=2 * n_pad * (c_pad * nc_pad + nc_pad * nc_pad),
        transcendentals=2 * n_pad,  # sqrt + reciprocal per row
        bytes_accessed=(x_p.size + w1_p.size + w2_p.size) * itemsize
        + (b1_p.size + b2_p.size) * 4
        + n_pad * nc_pad * 4,
    )

    out = pl.pallas_call(
        _mlp_l2norm_kernel,
        out_shape=jax.ShapeDtypeStruct((n_pad, nc_pad), jnp.float32),
        grid_spec=pltpu.PrefetchScalarGridSpec(
            num_scalar_prefetch=0,
            grid=(n_pad // tile_m,),
            in_specs=[
                pl.BlockSpec((tile_m, c_pad), lambda i: (i, 0)),   # x tile
                pl.BlockSpec((c_pad, nc_pad), lambda i: (0, 0)),   # W1 (resident)
                pl.BlockSpec((1, nc_pad), lambda i: (0, 0)),       # b1
                pl.BlockSpec((nc_pad, nc_pad), lambda i: (0, 0)),  # W2 (resident)
                pl.BlockSpec((1, nc_pad), lambda i: (0, 0)),       # b2
            ],
            out_specs=pl.BlockSpec((tile_m, nc_pad), lambda i: (i, 0)),
        ),
        compiler_params=pltpu.CompilerParams(
            dimension_semantics=("parallel",)),   # megacore-shardable when >1 step
        cost_estimate=cost,
    )(x_p, w1_p, b1_p, w2_p, b2_p)
    return out[:n, :nc]


def create_mlp_params(feats, nc, init_gain=0.02, key=None):
    """Per-feat MLP params, mirroring create_mlp + init_net('normal')."""
    params = []
    for feat in feats:
        c_in = feat.shape[1]
        key, k1, k2 = jax.random.split(key, 3)
        w1 = init_gain * jax.random.normal(k1, (c_in, nc), jnp.float32)  # N(0, 0.02)
        b1 = jnp.zeros((1, nc), jnp.float32)                              # bias = 0
        w2 = init_gain * jax.random.normal(k2, (nc, nc), jnp.float32)
        b2 = jnp.zeros((1, nc), jnp.float32)
        params.append((w1, b1, w2, b2))
    return params


def patch_sample_f(feats, params, num_patches=64, patch_ids=None, perm_key=None,
                   use_bf16=True):
    """Forward pass of PatchSampleF(use_mlp=True). feats are NCHW like PyTorch."""
    return_feats, return_ids = [], []
    for feat_id, feat in enumerate(feats):
        B, C, H, W = feat.shape
        if num_patches > 0:
            if patch_ids is not None:
                patch_id = patch_ids[feat_id]
            else:
                k = jax.random.fold_in(perm_key, feat_id)
                patch_id = jax.random.permutation(k, H * W)[: min(num_patches, H * W)]
            # Equivalent to permute(0,2,3,1).flatten(1,2)[:, patch_id, :].flatten(0,1),
            # but gathers from the contiguous (B, C, H*W) view first so only the P
            # sampled columns are transposed (no full-map HBM round trip).
            gathered = jnp.take(feat.reshape(B, C, H * W), patch_id, axis=2)  # (B, C, P)
            x_sample = jnp.transpose(gathered, (0, 2, 1)).reshape(-1, C)      # (B*P, C)
        else:
            # TODO(synk): num_patches == 0 branch (MLP over (B, H*W, C), l2-norm over the
            # H*W axis, reshape back to NCHW) is not exercised here.
            raise NotImplementedError("num_patches == 0 path not implemented")

        w1, b1, w2, b2 = params[feat_id]
        y = mlp_l2norm(x_sample, w1, b1, w2, b2, use_bf16=use_bf16)  # Pallas hot path
        return_feats.append(y)
        return_ids.append(patch_id)
    return return_feats, return_ids


def _reference_mlp_l2norm(x, w1, b1, w2, b2):
    h = jnp.maximum(x @ w1 + b1, 0.0)
    y = h @ w2 + b2
    norm = jnp.sqrt(jnp.sum(y * y, axis=-1, keepdims=True))
    return y / (norm + 1e-7)


if __name__ == "__main__":
    key = jax.random.PRNGKey(0)
    k_f0, k_f1, k_perm, k_params = jax.random.split(key, 4)

    # Small shapes consistent with the module's forward.
    B, H, W = 2, 16, 16
    nc = 32            # MLP hidden/output width (PyTorch default is 256)
    num_patches = 8

    feats = [
        jax.random.normal(k_f0, (B, 4, H, W), jnp.float32),   # feat 0: C=4
        jax.random.normal(k_f1, (B, 8, H, W), jnp.float32),   # feat 1: C=8
    ]
    params = create_mlp_params(feats, nc=nc, key=k_params)

    out_feats, out_ids = patch_sample_f(
        feats, params, num_patches=num_patches, perm_key=k_perm)
    jax.block_until_ready(out_feats)

    # Sanity checks: unit-norm rows + agreement with a pure-JAX f32 reference
    # (loose tolerance accounts for the intentional bf16 MXU inputs).
    for feat_id, (feat, y) in enumerate(zip(feats, out_feats)):
        assert y.shape == (B * num_patches, nc)
        norms = jnp.linalg.norm(y, axis=-1)
        assert bool(jnp.all(jnp.abs(norms - 1.0) < 1e-3)), "norm check failed"

        Bc, C, Hc, Wc = feat.shape
        patch_id = out_ids[feat_id]
        feat_reshape = jnp.transpose(feat, (0, 2, 3, 1)).reshape(Bc, Hc * Wc, C)
        x_sample_ref = feat_reshape[:, patch_id, :].reshape(-1, C)
        y_ref = _reference_mlp_l2norm(x_sample_ref, *params[feat_id])
        assert bool(jnp.max(jnp.abs(y - y_ref)) < 3e-2), "reference check failed"

    print("KERNEL_OK")
</pallas_src>

<mosaic_0001>
module attributes {stable_mosaic.version = 11 : i64} {
  func.func @_mlp_l2norm_kernel(%arg0: i32, %arg1: memref<256x128xbf16, #tpu.memory_space<vmem>>, %arg2: memref<128x128xbf16, #tpu.memory_space<vmem>>, %arg3: memref<1x128xf32, #tpu.memory_space<vmem>>, %arg4: memref<128x128xbf16, #tpu.memory_space<vmem>>, %arg5: memref<1x128xf32, #tpu.memory_space<vmem>>, %arg6: memref<256x128xf32, #tpu.memory_space<vmem>>) attributes {dimension_semantics = [#tpu.dimension_semantics<parallel>], iteration_bounds = array<i64: 1>, scalar_prefetch = 0 : i64, scratch_operands = 0 : i64, tpu.core_type = #tpu.core_type<tc>, window_params = [{transform_indices = @transform_0, window_bounds = array<i64: 256, 128>}, {pipeline_mode = #tpu.pipeline_mode<synchronous>, transform_indices = @transform_1, window_bounds = array<i64: 128, 128>}, {pipeline_mode = #tpu.pipeline_mode<synchronous>, transform_indices = @transform_2, window_bounds = array<i64: 1, 128>}, {pipeline_mode = #tpu.pipeline_mode<synchronous>, transform_indices = @transform_3, window_bounds = array<i64: 128, 128>}, {pipeline_mode = #tpu.pipeline_mode<synchronous>, transform_indices = @transform_4, window_bounds = array<i64: 1, 128>}, {transform_indices = @transform_5, window_bounds = array<i64: 256, 128>}]} {
    %c0 = arith.constant 0 : index
    %c0_0 = arith.constant 0 : index
    %0 = vector.load %arg1[%c0, %c0_0] : memref<256x128xbf16, #tpu.memory_space<vmem>>, vector<256x128xbf16>
    %c0_1 = arith.constant 0 : index
    %c0_2 = arith.constant 0 : index
    %1 = vector.load %arg2[%c0_1, %c0_2] : memref<128x128xbf16, #tpu.memory_space<vmem>>, vector<128x128xbf16>
    %cst = arith.constant dense<0.000000e+00> : vector<256x128xf32>
    %2 = tpu.matmul %0, %1, %cst {dimension_numbers = #tpu.dot_dimension_numbers<[1], [0], [0], [1], [0, 0, 1, 1], [], []>} : vector<256x128xbf16>, vector<128x128xbf16>, vector<256x128xf32> -> vector<256x128xf32>
    %c0_3 = arith.constant 0 : index
    %c0_4 = arith.constant 0 : index
    %3 = vector.load %arg3[%c0_3, %c0_4] : memref<1x128xf32, #tpu.memory_space<vmem>>, vector<1x128xf32>
    %4 = vector.broadcast %3 : vector<1x128xf32> to vector<256x128xf32>
    %5 = arith.addf %2, %4 : vector<256x128xf32>
    %cst_5 = arith.constant 0.000000e+00 : f32
    %6 = vector.broadcast %cst_5 : f32 to vector<256x128xf32>
    %7 = arith.maximumf %5, %6 : vector<256x128xf32>
    %8 = arith.truncf %7 : vector<256x128xf32> to vector<256x128xbf16>
    %c0_6 = arith.constant 0 : index
    %c0_7 = arith.constant 0 : index
    %9 = vector.load %arg4[%c0_6, %c0_7] : memref<128x128xbf16, #tpu.memory_space<vmem>>, vector<128x128xbf16>
    %cst_8 = arith.constant dense<0.000000e+00> : vector<256x128xf32>
    %10 = tpu.matmul %8, %9, %cst_8 {dimension_numbers = #tpu.dot_dimension_numbers<[1], [0], [0], [1], [0, 0, 1, 1], [], []>} : vector<256x128xbf16>, vector<128x128xbf16>, vector<256x128xf32> -> vector<256x128xf32>
    %c0_9 = arith.constant 0 : index
    %c0_10 = arith.constant 0 : index
    %11 = vector.load %arg5[%c0_9, %c0_10] : memref<1x128xf32, #tpu.memory_space<vmem>>, vector<1x128xf32>
    %12 = vector.broadcast %11 : vector<1x128xf32> to vector<256x128xf32>
    %13 = arith.addf %10, %12 : vector<256x128xf32>
    %14 = arith.mulf %13, %13 : vector<256x128xf32>
    %cst_11 = arith.constant dense<0.000000e+00> : vector<256xf32>
    %15 = vector.multi_reduction <add>, %14, %cst_11 [1] : vector<256x128xf32> to vector<256xf32>
    %16 = vector.shape_cast %15 : vector<256xf32> to vector<256x1xf32>
    %17 = math.sqrt %16 : vector<256x1xf32>
    %cst_12 = arith.constant 1.000000e-07 : f32
    %18 = vector.broadcast %cst_12 : f32 to vector<256x1xf32>
    %19 = arith.addf %17, %18 : vector<256x1xf32>
    %20 = tpu.reciprocal %19 : vector<256x1xf32> -> vector<256x1xf32>
    %21 = vector.broadcast %20 : vector<256x1xf32> to vector<256x128xf32>
    %22 = arith.mulf %13, %21 : vector<256x128xf32>
    %c0_13 = arith.constant 0 : index
    %c0_14 = arith.constant 0 : index
    %23 = vector.load %arg6[%c0_13, %c0_14] : memref<256x128xf32, #tpu.memory_space<vmem>>, vector<256x128xf32>
    tpu.vector_store %arg6[%c0_13, %c0_14], %22 {strides = array<i32>} : memref<256x128xf32, #tpu.memory_space<vmem>>, vector<256x128xf32>,
    return
  }
  func.func @transform_0(%arg0: i32) -> (i32, i32) {
    %c0_i32 = arith.constant 0 : i32
    %c0_i32_0 = arith.constant 0 : i32
    return %arg0, %c0_i32 : i32, i32
  }
  func.func @transform_1(%arg0: i32) -> (i32, i32) {
    %c0_i32 = arith.constant 0 : i32
    %c0_i32_0 = arith.constant 0 : i32
    %c0_i32_1 = arith.constant 0 : i32
    return %c0_i32, %c0_i32_0 : i32, i32
  }
  func.func @transform_2(%arg0: i32) -> (i32, i32) {
    %c0_i32 = arith.constant 0 : i32
    %c0_i32_0 = arith.constant 0 : i32
    %c0_i32_1 = arith.constant 0 : i32
    return %c0_i32, %c0_i32_0 : i32, i32
  }
  func.func @transform_3(%arg0: i32) -> (i32, i32) {
    %c0_i32 = arith.constant 0 : i32
    %c0_i32_0 = arith.constant 0 : i32
    %c0_i32_1 = arith.constant 0 : i32
    return %c0_i32, %c0_i32_0 : i32, i32
  }
  func.func @transform_4(%arg0: i32) -> (i32, i32) {
    %c0_i32 = arith.constant 0 : i32
    %c0_i32_0 = arith.constant 0 : i32
    %c0_i32_1 = arith.constant 0 : i32
    return %c0_i32, %c0_i32_0 : i32, i32
  }
  func.func @transform_5(%arg0: i32) -> (i32, i32) {
    %c0_i32 = arith.constant 0 : i32
    %c0_i32_0 = arith.constant 0 : i32
    return %arg0, %c0_i32 : i32, i32
  }
}

</mosaic_0001>

<bundles_post_ra>
// kernel: tpu_custom_call.1
= control target key start
LH: loop header
LB: loop body
LE: loop exit
PB: predicated region body
PF: predicated region fallthrough
CT: control target
= control target key end

     0   :  { %10 = vsyncpa [#allocation3], 0  ;;  %s2998_s0 = inlined_call_operand.hbm [shape: bf16[256,128], index: 0, kind: input, shape index: {}]   ;;  %s2999_s1 = inlined_call_operand.hbm [shape: bf16[128,128], index: 1, kind: input, shape index: {}]   ;;  %s3000_s2 = inlined_call_operand.vmem [shape: f32[1,128], index: 2, kind: input, shape index: {}]   ;;  %s3001_s3 = inlined_call_operand.hbm [shape: bf16[128,128], index: 3, kind: input, shape index: {}]   ;;  %s3002_s4 = inlined_call_operand.vmem [shape: f32[1,128], index: 4, kind: input, shape index: {}]   ;;  %s3003_s5 = inlined_call_operand.hbm [shape: f32[256,128], index: 5, kind: output, shape index: {}]  }
   0x1   :  { %11 = vsyncpa [#allocation6], 0 }
   0x2   :  { %12 = vsyncpa [#allocation4], 0  ;;  %s30_s20 = sshll.u32 %s2999_s1, 4  ;;  %s2018_s21 = smov [#allocation5]   ;;  %s31_s20 = int_to_ptr.hbm [resolvable:$true] %s30_s20 }
   0x3   :  { %s32_s22 = sshll.u32 %s2018_s21, 4  ;;  %s17_s25 = sshll.u32 %s2998_s0, 4  ;;  %s33_s22 = int_to_ptr.vmem [resolvable:$true] %s32_s22  ;;  %s18_s25 = int_to_ptr.hbm [resolvable:$true] %s17_s25 }
   0x4   :  { %s2019_s26 = smov 64   ;;  %s2020_s27 = smov 4  }
   0x5   :  { %38 = dma.hbm_to_vmem [thread:$0]  %s31_s20, 1024, %s33_s22, [#allocation6], %s2019_s26, %s2019_s26, %s2020_s27  }
   0x6   :  { %s2021_s28 = smov [#allocation2]   ;;  %s45_s7 = sshll.u32 %s3001_s3, 4  ;;  %s46_s7 = int_to_ptr.hbm [resolvable:$true] %s45_s7 }
   0x7   :  { %s19_s29 = sshll.u32 %s2021_s28, 4  ;;  %s2022_s1 = smov [#allocation7]   ;;  %s20_s29 = int_to_ptr.vmem [resolvable:$true] %s19_s29 }
   0x8   :  { %25 = dma.hbm_to_vmem [thread:$0]  %s18_s25, 2048, %s20_s29, [#allocation3], %s2019_s26, %s2019_s26, %s2020_s27  }
   0x9   :  { %s47_s8 = sshll.u32 %s2022_s1, 4  ;;  %s48_s8 = int_to_ptr.vmem [resolvable:$true] %s47_s8 }
   0xa   :  { %53 = dma.hbm_to_vmem [thread:$0]  %s46_s7, 1024, %s48_s8, [#allocation6], %s2019_s26, %s2019_s26, %s2020_s27  }
   0xb   :  { %2012 = dma.done.wait [#allocation3], 2048  }
   0xc   :  { %2013 = vsyncadd [#allocation3], 4294965248 }
   0xd   :  { %2014 = dma.done.wait [#allocation6], 2048  }
   0xe   :  { %2015 = vsyncadd [#allocation6], 4294965248  ;;  %v1753_v0 = vld [vmem:[#allocation5 + $0x38] sm:$0xff]  ;;  %v1752_v1 = vld [vmem:[#allocation5 + $0x30] sm:$0xff]  ;;  %s1588_s13 = sshll.u32 %s3003_s5, 4  ;;  %s2024_s14 = smov 128   ;;  %s1589_s13 = int_to_ptr.hbm [resolvable:$true] %s1588_s13 }
   0xf   :  { %264 = vmatpush.bf16.msra.mxu0 %v1753_v0  ;;  %1762 = vmatpush.bf16.msra.mxu2 %v1753_v0  ;;  %v1751_v2 = vld [vmem:[#allocation5 + $0x28] sm:$0xff]  ;;  %v1750_v3 = vld [vmem:[#allocation5 + $0x20] sm:$0xff]  ;;  %v1749_v4 = vld [vmem:[#allocation5 + $0x18] sm:$0xff]  ;;  %s2025_s15 = smov 8  }
  0x10   :  { %v1748_v5 = vld [vmem:[#allocation5 + $0x10] sm:$0xff]  ;;  %v1747_v6 = vld [vmem:[#allocation5 + $0x8] sm:$0xff]  ;;  %v1746_v7 = vld [vmem:[#allocation5] sm:$0xff] }
  0x11   :  { %v1730_v8 = vld [vmem:[#allocation2] sm:$0xff]  ;;  %v1731_v10 = vld [vmem:[#allocation2 + $0x8] sm:$0xff]  ;;  %v1732_v12 = vld [vmem:[#allocation2 + $0x10] sm:$0xff] }
  0x12   :  { %v1738_v9 = vld [vmem:[#allocation2 + $0x40] sm:$0xff]  ;;  %v1739_v11 = vld [vmem:[#allocation2 + $0x48] sm:$0xff]  ;;  %v1740_v13 = vld [vmem:[#allocation2 + $0x50] sm:$0xff] }
  0x13   :  { %265 = vmatpush.bf16.msra.mxu0 %v1752_v1  ;;  %1763 = vmatpush.bf16.msra.mxu2 %v1752_v1  ;;  %v1733_v14 = vld [vmem:[#allocation2 + $0x18] sm:$0xff]  ;;  %v1734_v16 = vld [vmem:[#allocation2 + $0x20] sm:$0xff]  ;;  %v1735_v19 = vld [vmem:[#allocation2 + $0x28] sm:$0xff] }
  0x14   :  { %v1741_v15 = vld [vmem:[#allocation2 + $0x58] sm:$0xff]  ;;  %v1742_v17 = vld [vmem:[#allocation2 + $0x60] sm:$0xff]  ;;  %v1743_v20 = vld [vmem:[#allocation2 + $0x68] sm:$0xff] }
  0x15   :  { %v1761_v18 = vld [vmem:[#allocation7 + $0x38] sm:$0xff]  ;;  %v1760_v21 = vld [vmem:[#allocation7 + $0x30] sm:$0xff]  ;;  %v1759_v22 = vld [vmem:[#allocation7 + $0x28] sm:$0xff] }
  0x16   :  { %469 = vmatpush.bf16.msra.mxu1 %v1761_v18  ;;  %1770 = vmatpush.bf16.msra.mxu3 %v1761_v18  ;;  %v1758_v23 = vld [vmem:[#allocation7 + $0x20] sm:$0xff]  ;;  %v1757_v24 = vld [vmem:[#allocation7 + $0x18] sm:$0xff]  ;;  %v1736_v25 = vld [vmem:[#allocation2 + $0x30] sm:$0xff] }
  0x17   :  { %266 = vmatpush.bf16.msra.mxu0 %v1751_v2  ;;  %1764 = vmatpush.bf16.msra.mxu2 %v1751_v2  ;;  %v1744_v26 = vld [vmem:[#allocation2 + $0x70] sm:$0xff]  ;;  %v1755_v28 = vld [vmem:[#allocation7 + $0x8] sm:$0xff]  ;;  %v1754_v29 = vld [vmem:[#allocation7] sm:$0xff] }
  0x18   :  { %v1756_v27 = vld [vmem:[#allocation7 + $0x10] sm:$0xff]  ;;  %v1737_v30 = vld [vmem:[#allocation2 + $0x38] sm:$0xff]  ;;  %v2068_v33 = vld [vmem:[%s3000_s2] ss:$0 sm:$0xff] }
  0x19   :  { %v1745_v31 = vld [vmem:[#allocation2 + $0x78] sm:$0xff] }
  0x1a   :  { %470 = vmatpush.bf16.msra.mxu1 %v1760_v21  ;;  %1771 = vmatpush.bf16.msra.mxu3 %v1760_v21 }
  0x1b   :  { %267 = vmatpush.bf16.msra.mxu0 %v1750_v3  ;;  %1765 = vmatpush.bf16.msra.mxu2 %v1750_v3 }
  0x1e   :  { %471 = vmatpush.bf16.msra.mxu1 %v1759_v22  ;;  %1772 = vmatpush.bf16.msra.mxu3 %v1759_v22 }
  0x1f   :  { %268 = vmatpush.bf16.msra.mxu0 %v1749_v4  ;;  %1766 = vmatpush.bf16.msra.mxu2 %v1749_v4 }
  0x22   :  { %472 = vmatpush.bf16.msra.mxu1 %v1758_v23  ;;  %1773 = vmatpush.bf16.msra.mxu3 %v1758_v23 }
  0x23   :  { %269 = vmatpush.bf16.msra.mxu0 %v1748_v5  ;;  %1767 = vmatpush.bf16.msra.mxu2 %v1748_v5 }
  0x26   :  { %473 = vmatpush.bf16.msra.mxu1 %v1757_v24  ;;  %1774 = vmatpush.bf16.msra.mxu3 %v1757_v24 }
  0x27   :  { %270 = vmatpush.bf16.msra.mxu0 %v1747_v6  ;;  %1768 = vmatpush.bf16.msra.mxu2 %v1747_v6 }
  0x2a   :  { %474 = vmatpush.bf16.msra.mxu1 %v1756_v27  ;;  %1775 = vmatpush.bf16.msra.mxu3 %v1756_v27 }
  0x2b   :  { %271 = vmatpush.bf16.msra.mxu0 %v1746_v7  ;;  %1769 = vmatpush.bf16.msra.mxu2 %v1746_v7 }
  0x2e   :  { %272 = vmatmul.bf16.vlgmr.msra.gmra.mxu0 %v1730_v8  ;;  %312 = vmatmul.bf16.vlgmr.msra.gmra.mxu2 %v1738_v9 }
  0x2f   :  { %475 = vmatpush.bf16.msra.mxu1 %v1755_v28  ;;  %1776 = vmatpush.bf16.msra.mxu3 %v1755_v28 }
  0x33   :  { %476 = vmatpush.bf16.msra.mxu1 %v1754_v29  ;;  %1777 = vmatpush.bf16.msra.mxu3 %v1754_v29 }
  0x3e   :  { %277 = vmatmul.bf16.gmra.mxu0 %v1731_v10  ;;  %317 = vmatmul.bf16.gmra.mxu2 %v1739_v11 }
  0x4e   :  { %282 = vmatmul.bf16.gmra.mxu0 %v1732_v12  ;;  %322 = vmatmul.bf16.gmra.mxu2 %v1740_v13 }
  0x5e   :  { %287 = vmatmul.bf16.gmra.mxu0 %v1733_v14  ;;  %327 = vmatmul.bf16.gmra.mxu2 %v1741_v15 }
  0x6e   :  { %292 = vmatmul.bf16.gmra.mxu0 %v1734_v16  ;;  %332 = vmatmul.bf16.gmra.mxu2 %v1742_v17 }
  0x7e   :  { %297 = vmatmul.bf16.gmra.mxu0 %v1735_v19  ;;  %337 = vmatmul.bf16.gmra.mxu2 %v1743_v20 }
  0x8e   :  { %302 = vmatmul.bf16.gmra.mxu0 %v1736_v25  ;;  %342 = vmatmul.bf16.gmra.mxu2 %v1744_v26 }
  0x9e   :  { %307 = vmatmul.bf16.gmra.mxu0 %v1737_v30  ;;  %347 = vmatmul.bf16.gmra.mxu2 %v1745_v31 }
  0xab   :  { %v273_v32 = vpop.f32.mrf.mxu0 }
  0xac   :  { %v274_v35 = vadd.f32 %v2068_v33, %v273_v32 }
  0xae   :  { %v353_v38 = vmax.f32 %v274_v35, 0.0 }
  0xb1   :  { %v313_v34 = vpop.f32.mrf.mxu2 }
  0xb2   :  { %v314_v40 = vadd.f32 %v2068_v33, %v313_v34 }
  0xb3   :  { %v275_v36 = vpop.f32.mrf.mxu0 }
  0xb4   :  { %v276_v37 = vadd.f32 %v2068_v33, %v275_v36  ;;  %v369_v45 = vmax.f32 %v314_v40, 0.0 }
  0xb6   :  { %v354_v39 = vmax.f32 %v276_v37, 0.0 }
  0xb8   :  { %v385_v41 = vpack.c.bf16 %v354_v39, %v353_v38 }
  0xb9   :  { %v315_v42 = vpop.f32.mrf.mxu2 }
  0xba   :  { %v316_v43 = vadd.f32 %v2068_v33, %v315_v42  ;;  %477 = vmatmul.bf16.vlgmr.msra.gmra.mxu1 %v385_v41 }
  0xbb   :  { %v278_v44 = vpop.f32.mrf.mxu0 }
  0xbc   :  { %v370_v46 = vmax.f32 %v316_v43, 0.0  ;;  %v279_v49 = vadd.f32 %v2068_v33, %v278_v44 }
  0xbe   :  { %v393_v47 = vpack.c.bf16 %v370_v46, %v369_v45  ;;  %v355_v52 = vmax.f32 %v279_v49, 0.0 }
  0xc0   :  { %517 = vmatmul.bf16.vlgmr.msra.gmra.mxu3 %v393_v47 }
  0xc1   :  { %v318_v48 = vpop.f32.mrf.mxu2 }
  0xc2   :  { %v319_v54 = vadd.f32 %v2068_v33, %v318_v48 }
  0xc3   :  { %v280_v50 = vpop.f32.mrf.mxu0 }
  0xc4   :  { %v281_v51 = vadd.f32 %v2068_v33, %v280_v50  ;;  %v371_v59 = vmax.f32 %v319_v54, 0.0 }
  0xc6   :  { %v356_v53 = vmax.f32 %v281_v51, 0.0 }
  0xc8   :  { %v386_v55 = vpack.c.bf16 %v356_v53, %v355_v52 }
  0xc9   :  { %v320_v56 = vpop.f32.mrf.mxu2 }
  0xca   :  { %v321_v57 = vadd.f32 %v2068_v33, %v320_v56  ;;  %482 = vmatmul.bf16.gmra.mxu1 %v386_v55 }
  0xcb   :  { %v283_v58 = vpop.f32.mrf.mxu0 }
  0xcc   :  { %v372_v60 = vmax.f32 %v321_v57, 0.0  ;;  %v284_v63 = vadd.f32 %v2068_v33, %v283_v58 }
  0xce   :  { %v394_v61 = vpack.c.bf16 %v372_v60, %v371_v59  ;;  %v357_v2 = vmax.f32 %v284_v63, 0.0 }
  0xd0   :  { %522 = vmatmul.bf16.gmra.mxu3 %v394_v61 }
  0xd1   :  { %v323_v62 = vpop.f32.mrf.mxu2 }
  0xd2   :  { %v324_v4 = vadd.f32 %v2068_v33, %v323_v62 }
  0xd3   :  { %v285_v0 = vpop.f32.mrf.mxu0 }
  0xd4   :  { %v286_v1 = vadd.f32 %v2068_v33, %v285_v0  ;;  %v373_v9 = vmax.f32 %v324_v4, 0.0 }
  0xd6   :  { %v358_v3 = vmax.f32 %v286_v1, 0.0 }
  0xd8   :  { %v387_v5 = vpack.c.bf16 %v358_v3, %v357_v2 }
  0xd9   :  { %v325_v6 = vpop.f32.mrf.mxu2 }
  0xda   :  { %v326_v7 = vadd.f32 %v2068_v33, %v325_v6  ;;  %487 = vmatmul.bf16.gmra.mxu1 %v387_v5 }
  0xdb   :  { %v288_v8 = vpop.f32.mrf.mxu0 }
  0xdc   :  { %v374_v10 = vmax.f32 %v326_v7, 0.0  ;;  %v289_v13 = vadd.f32 %v2068_v33, %v288_v8 }
  0xde   :  { %v395_v11 = vpack.c.bf16 %v374_v10, %v373_v9  ;;  %v359_v16 = vmax.f32 %v289_v13, 0.0 }
  0xe0   :  { %527 = vmatmul.bf16.gmra.mxu3 %v395_v11 }
  0xe1   :  { %v328_v12 = vpop.f32.mrf.mxu2 }
  0xe2   :  { %v329_v18 = vadd.f32 %v2068_v33, %v328_v12 }
  0xe3   :  { %v290_v14 = vpop.f32.mrf.mxu0 }
  0xe4   :  { %v291_v15 = vadd.f32 %v2068_v33, %v290_v14  ;;  %v375_v23 = vmax.f32 %v329_v18, 0.0  ;;  %v2105_v18 = vld [vmem:[%s3002_s4] ss:$0 sm:$0xff]  ;;  %s2023_s4 = smov [#allocation8]  }
  0xe5   :  { %s1586_s10 = sshll.u32 %s2023_s4, 4  ;;  %s1587_s10 = int_to_ptr.vmem [resolvable:$true] %s1586_s10 }
  0xe6   :  { %v360_v17 = vmax.f32 %v291_v15, 0.0 }
  0xe8   :  { %v388_v19 = vpack.c.bf16 %v360_v17, %v359_v16 }
  0xe9   :  { %v330_v20 = vpop.f32.mrf.mxu2 }
  0xea   :  { %v331_v21 = vadd.f32 %v2068_v33, %v330_v20  ;;  %492 = vmatmul.bf16.gmra.mxu1 %v388_v19 }
  0xeb   :  { %v293_v22 = vpop.f32.mrf.mxu0 }
  0xec   :  { %v376_v24 = vmax.f32 %v331_v21, 0.0  ;;  %v294_v27 = vadd.f32 %v2068_v33, %v293_v22 }
  0xee   :  { %v396_v25 = vpack.c.bf16 %v376_v24, %v375_v23  ;;  %v361_v30 = vmax.f32 %v294_v27, 0.0 }
  0xf0   :  { %532 = vmatmul.bf16.gmra.mxu3 %v396_v25 }
  0xf1   :  { %v333_v26 = vpop.f32.mrf.mxu2 }
  0xf2   :  { %v334_v32 = vadd.f32 %v2068_v33, %v333_v26 }
  0xf3   :  { %v295_v28 = vpop.f32.mrf.mxu0 }
  0xf4   :  { %v296_v29 = vadd.f32 %v2068_v33, %v295_v28  ;;  %v377_v38 = vmax.f32 %v334_v32, 0.0 }
  0xf6   :  { %v362_v31 = vmax.f32 %v296_v29, 0.0 }
  0xf8   :  { %v389_v34 = vpack.c.bf16 %v362_v31, %v361_v30 }
  0xf9   :  { %v335_v35 = vpop.f32.mrf.mxu2 }
  0xfa   :  { %v336_v36 = vadd.f32 %v2068_v33, %v335_v35  ;;  %497 = vmatmul.bf16.gmra.mxu1 %v389_v34 }
  0xfb   :  { %v298_v37 = vpop.f32.mrf.mxu0 }
  0xfc   :  { %v378_v39 = vmax.f32 %v336_v36, 0.0  ;;  %v299_v42 = vadd.f32 %v2068_v33, %v298_v37 }
  0xfe   :  { %v397_v40 = vpack.c.bf16 %v378_v39, %v377_v38  ;;  %v363_v45 = vmax.f32 %v299_v42, 0.0 }
 0x100   :  { %537 = vmatmul.bf16.gmra.mxu3 %v397_v40 }
 0x101   :  { %v338_v41 = vpop.f32.mrf.mxu2 }
 0x102   :  { %v339_v47 = vadd.f32 %v2068_v33, %v338_v41 }
 0x103   :  { %v300_v43 = vpop.f32.mrf.mxu0 }
 0x104   :  { %v301_v44 = vadd.f32 %v2068_v33, %v300_v43  ;;  %v379_v52 = vmax.f32 %v339_v47, 0.0 }
 0x106   :  { %v364_v46 = vmax.f32 %v301_v44, 0.0 }
 0x108   :  { %v390_v48 = vpack.c.bf16 %v364_v46, %v363_v45 }
 0x109   :  { %v340_v49 = vpop.f32.mrf.mxu2 }
 0x10a   :  { %v341_v50 = vadd.f32 %v2068_v33, %v340_v49  ;;  %502 = vmatmul.bf16.gmra.mxu1 %v390_v48 }
 0x10b   :  { %v303_v51 = vpop.f32.mrf.mxu0 }
 0x10c   :  { %v380_v53 = vmax.f32 %v341_v50, 0.0  ;;  %v304_v56 = vadd.f32 %v2068_v33, %v303_v51 }
 0x10e   :  { %v398_v54 = vpack.c.bf16 %v380_v53, %v379_v52  ;;  %v365_v59 = vmax.f32 %v304_v56, 0.0 }
 0x110   :  { %542 = vmatmul.bf16.gmra.mxu3 %v398_v54 }
 0x111   :  { %v343_v55 = vpop.f32.mrf.mxu2 }
 0x112   :  { %v344_v61 = vadd.f32 %v2068_v33, %v343_v55 }
 0x113   :  { %v305_v57 = vpop.f32.mrf.mxu0 }
 0x114   :  { %v306_v58 = vadd.f32 %v2068_v33, %v305_v57  ;;  %v381_v2 = vmax.f32 %v344_v61, 0.0 }
 0x116   :  { %v366_v60 = vmax.f32 %v306_v58, 0.0 }
 0x118   :  { %v391_v62 = vpack.c.bf16 %v366_v60, %v365_v59 }
 0x119   :  { %v345_v63 = vpop.f32.mrf.mxu2 }
 0x11a   :  { %v346_v0 = vadd.f32 %v2068_v33, %v345_v63  ;;  %507 = vmatmul.bf16.gmra.mxu1 %v391_v62 }
 0x11b   :  { %v308_v1 = vpop.f32.mrf.mxu0 }
 0x11c   :  { %v382_v3 = vmax.f32 %v346_v0, 0.0  ;;  %v309_v6 = vadd.f32 %v2068_v33, %v308_v1 }
 0x11e   :  { %v399_v4 = vpack.c.bf16 %v382_v3, %v381_v2  ;;  %v367_v9 = vmax.f32 %v309_v6, 0.0 }
 0x120   :  { %547 = vmatmul.bf16.gmra.mxu3 %v399_v4 }
 0x121   :  { %v348_v5 = vpop.f32.mrf.mxu2 }
 0x122   :  { %v349_v11 = vadd.f32 %v2068_v33, %v348_v5 }
 0x123   :  { %v310_v7 = vpop.f32.mrf.mxu0 }
 0x124   :  { %v311_v8 = vadd.f32 %v2068_v33, %v310_v7  ;;  %v383_v15 = vmax.f32 %v349_v11, 0.0 }
 0x126   :  { %v368_v10 = vmax.f32 %v311_v8, 0.0 }
 0x128   :  { %v392_v12 = vpack.c.bf16 %v368_v10, %v367_v9 }
 0x129   :  { %v350_v13 = vpop.f32.mrf.mxu2 }
 0x12a   :  { %v351_v14 = vadd.f32 %v2068_v33, %v350_v13  ;;  %512 = vmatmul.bf16.gmra.mxu1 %v392_v12 }
 0x12c   :  { %v384_v16 = vmax.f32 %v351_v14, 0.0 }
 0x12e   :  { %v400_v17 = vpack.c.bf16 %v384_v16, %v383_v15 }
 0x130   :  { %552 = vmatmul.bf16.gmra.mxu3 %v400_v17 }
 0x137   :  { %v478_v19 = vpop.f32.mrf.mxu1 }
 0x138   :  { %v2108_v20 = vadd.f32 %v2105_v18, %v478_v19 }
 0x13a   :  { %v558_v21 = vmul.f32 %v2108_v20, %v2108_v20 }
 0x13c   :  { %590 = vadd.xlane.f32.xlu0 %v558_v21 }
 0x13f   :  { %v480_v22 = vpop.f32.mrf.mxu1 }
 0x140   :  { %v2113_v33 = vadd.f32 %v2105_v18, %v480_v22 }
 0x142   :  { %v559_v23 = vmul.f32 %v2113_v33, %v2113_v33 }
 0x143   :  { %v518_v24 = vpop.f32.mrf.mxu3 }
 0x144   :  { %v2118_v25 = vadd.f32 %v2105_v18, %v518_v24  ;;  %592 = vadd.xlane.f32.xlu0 %v559_v23 }
 0x146   :  { %v574_v26 = vmul.f32 %v2118_v25, %v2118_v25 }
 0x147   :  { %v483_v27 = vpop.f32.mrf.mxu1 }
 0x148   :  { %622 = vadd.xlane.f32.xlu1 %v574_v26  ;;  %v2123_v28 = vadd.f32 %v2105_v18, %v483_v27 }
 0x14a   :  { %v560_v32 = vmul.f32 %v2123_v28, %v2123_v28 }
 0x14b   :  { %v520_v29 = vpop.f32.mrf.mxu3 }
 0x14c   :  { %v2126_v30 = vadd.f32 %v2105_v18, %v520_v29 }
 0x14e   :  { %v575_v31 = vmul.f32 %v2126_v30, %v2126_v30 }
 0x14f   :  { %v485_v34 = vpop.f32.mrf.mxu1 }
 0x150   :  { %624 = vadd.xlane.f32.xlu2 %v575_v31  ;;  %594 = vadd.xlane.f32.xlu1 %v560_v32  ;;  %v2133_v35 = vadd.f32 %v2105_v18, %v485_v34 }
 0x152   :  { %v561_v38 = vmul.f32 %v2133_v35, %v2133_v35 }
 0x153   :  { %v523_v36 = vpop.f32.mrf.mxu3 }
 0x154   :  { %v2136_v37 = vadd.f32 %v2105_v18, %v523_v36 }
 0x156   :  { %v576_v39 = vmul.f32 %v2136_v37, %v2136_v37 }
 0x157   :  { %v488_v40 = vpop.f32.mrf.mxu1 }
 0x158   :  { %v2143_v41 = vadd.f32 %v2105_v18, %v488_v40  ;;  %596 = vadd.xlane.f32.xlu1 %v561_v38  ;;  %626 = vadd.xlane.f32.xlu0 %v576_v39 }
 0x15a   :  { %v562_v42 = vmul.f32 %v2143_v41, %v2143_v41 }
 0x15b   :  { %v525_v43 = vpop.f32.mrf.mxu3 }
 0x15c   :  { %v2148_v44 = vadd.f32 %v2105_v18, %v525_v43  ;;  %598 = vadd.xlane.f32.xlu2 %v562_v42 }
 0x15e   :  { %v577_v45 = vmul.f32 %v2148_v44, %v2148_v44 }
 0x15f   :  { %v490_v46 = vpop.f32.mrf.mxu1 }
 0x160   :  { %v2153_v47 = vadd.f32 %v2105_v18, %v490_v46  ;;  %628 = vadd.xlane.f32.xlu1 %v577_v45 }
 0x162   :  { %v563_v48 = vmul.f32 %v2153_v47, %v2153_v47 }
 0x163   :  { %v528_v49 = vpop.f32.mrf.mxu3 }
 0x164   :  { %600 = vadd.xlane.f32.xlu2 %v563_v48  ;;  %v2158_v50 = vadd.f32 %v2105_v18, %v528_v49 }
 0x166   :  { %v578_v53 = vmul.f32 %v2158_v50, %v2158_v50 }
 0x167   :  { %v493_v51 = vpop.f32.mrf.mxu1 }
 0x168   :  { %v2161_v52 = vadd.f32 %v2105_v18, %v493_v51 }
 0x16a   :  { %v564_v54 = vmul.f32 %v2161_v52, %v2161_v52 }
 0x16b   :  { %v530_v55 = vpop.f32.mrf.mxu3 }
 0x16c   :  { %630 = vadd.xlane.f32.xlu2 %v578_v53  ;;  %602 = vadd.xlane.f32.xlu0 %v564_v54  ;;  %v2168_v56 = vadd.f32 %v2105_v18, %v530_v55 }
 0x16e   :  { %v579_v60 = vmul.f32 %v2168_v56, %v2168_v56 }
 0x16f   :  { %v495_v57 = vpop.f32.mrf.mxu1 }
 0x170   :  { %v2171_v58 = vadd.f32 %v2105_v18, %v495_v57 }
 0x172   :  { %v565_v59 = vmul.f32 %v2171_v58, %v2171_v58 }
 0x173   :  { %v533_v61 = vpop.f32.mrf.mxu3 }
 0x174   :  { %604 = vadd.xlane.f32.xlu1 %v565_v59  ;;  %632 = vadd.xlane.f32.xlu0 %v579_v60  ;;  %v2178_v62 = vadd.f32 %v2105_v18, %v533_v61 }
 0x176   :  { %v580_v2 = vmul.f32 %v2178_v62, %v2178_v62 }
 0x177   :  { %v498_v63 = vpop.f32.mrf.mxu1 }
 0x178   :  { %v2181_v0 = vadd.f32 %v2105_v18, %v498_v63 }
 0x17a   :  { %v566_v1 = vmul.f32 %v2181_v0, %v2181_v0 }
 0x17b   :  { %v535_v3 = vpop.f32.mrf.mxu3 }
 0x17c   :  { %606 = vadd.xlane.f32.xlu2 %v566_v1  ;;  %634 = vadd.xlane.f32.xlu1 %v580_v2  ;;  %v2188_v4 = vadd.f32 %v2105_v18, %v535_v3 }
 0x17e   :  { %v581_v7 = vmul.f32 %v2188_v4, %v2188_v4 }
 0x17f   :  { %v500_v5 = vpop.f32.mrf.mxu1 }
 0x180   :  { %v2191_v6 = vadd.f32 %v2105_v18, %v500_v5 }
 0x182   :  { %v567_v8 = vmul.f32 %v2191_v6, %v2191_v6 }
 0x183   :  { %v538_v9 = vpop.f32.mrf.mxu3 }
 0x184   :  { %636 = vadd.xlane.f32.xlu2 %v581_v7  ;;  %608 = vadd.xlane.f32.xlu0 %v567_v8  ;;  %v2198_v10 = vadd.f32 %v2105_v18, %v538_v9 }
 0x186   :  { %v582_v14 = vmul.f32 %v2198_v10, %v2198_v10 }
 0x187   :  { %v503_v11 = vpop.f32.mrf.mxu1 }
 0x188   :  { %v2201_v12 = vadd.f32 %v2105_v18, %v503_v11 }
 0x18a   :  { %v568_v13 = vmul.f32 %v2201_v12, %v2201_v12 }
 0x18b   :  { %v540_v15 = vpop.f32.mrf.mxu3 }
 0x18c   :  { %610 = vadd.xlane.f32.xlu1 %v568_v13  ;;  %638 = vadd.xlane.f32.xlu0 %v582_v14  ;;  %v2208_v16 = vadd.f32 %v2105_v18, %v540_v15 }
 0x18e   :  { %v583_v22 = vmul.f32 %v2208_v16, %v2208_v16 }
 0x18f   :  { %v505_v17 = vpop.f32.mrf.mxu1 }
 0x190   :  { %v2211_v19 = vadd.f32 %v2105_v18, %v505_v17 }
 0x192   :  { %v569_v21 = vmul.f32 %v2211_v19, %v2211_v19 }
 0x193   :  { %v543_v23 = vpop.f32.mrf.mxu3 }
 0x194   :  { %612 = vadd.xlane.f32.xlu2 %v569_v21  ;;  %640 = vadd.xlane.f32.xlu1 %v583_v22  ;;  %v2218_v24 = vadd.f32 %v2105_v18, %v543_v23 }
 0x196   :  { %v584_v29 = vmul.f32 %v2218_v24, %v2218_v24 }
 0x197   :  { %v508_v26 = vpop.f32.mrf.mxu1 }
 0x198   :  { %v2221_v27 = vadd.f32 %v2105_v18, %v508_v26 }
 0x19a   :  { %v570_v31 = vmul.f32 %v2221_v27, %v2221_v27 }
 0x19b   :  { %v545_v32 = vpop.f32.mrf.mxu3 }
 0x19c   :  { %642 = vadd.xlane.f32.xlu2 %v584_v29  ;;  %614 = vadd.xlane.f32.xlu0 %v570_v31  ;;  %v2228_v34 = vadd.f32 %v2105_v18, %v545_v32 }
 0x19e   :  { %v585_v40 = vmul.f32 %v2228_v34, %v2228_v34 }
 0x19f   :  { %v510_v36 = vpop.f32.mrf.mxu1 }
 0x1a0   :  { %v2231_v38 = vadd.f32 %v2105_v18, %v510_v36 }
 0x1a2   :  { %v571_v39 = vmul.f32 %v2231_v38, %v2231_v38 }
 0x1a3   :  { %v548_v42 = vpop.f32.mrf.mxu3 }
 0x1a4   :  { %616 = vadd.xlane.f32.xlu1 %v571_v39  ;;  %644 = vadd.xlane.f32.xlu0 %v585_v40  ;;  %v2238_v43 = vadd.f32 %v2105_v18, %v548_v42 }
 0x1a6   :  { %v586_v49 = vmul.f32 %v2238_v43, %v2238_v43 }
 0x1a7   :  { %v513_v45 = vpop.f32.mrf.mxu1 }
 0x1a8   :  { %v2241_v46 = vadd.f32 %v2105_v18, %v513_v45 }
 0x1aa   :  { %v572_v48 = vmul.f32 %v2241_v46, %v2241_v46 }
 0x1ab   :  { %v550_v51 = vpop.f32.mrf.mxu3 }
 0x1ac   :  { %618 = vadd.xlane.f32.xlu2 %v572_v48  ;;  %646 = vadd.xlane.f32.xlu1 %v586_v49  ;;  %v2248_v53 = vadd.f32 %v2105_v18, %v550_v51 }
 0x1ae   :  { %v587_v59 = vmul.f32 %v2248_v53, %v2248_v53 }
 0x1af   :  { %v515_v54 = vpop.f32.mrf.mxu1  ;;  %v591_v55 = vpop.xlane.xlu0 %590 }
 0x1b0   :  { %v2251_v57 = vadd.f32 %v2105_v18, %v515_v54  ;;  %1788 = vrsqrt.f32 %v591_v55  ;;  %vm661_vm0 = vcmp.eq.f32.partialorder %v591_v55, inf  ;;  %v664_v31 = vand.u32 2147483648, %v591_v55 }
 0x1b1   :  { %vm663_vm1 = vcmp.eq.f32.partialorder %v591_v55, 0.0 }
 0x1b2   :  { %v573_v60 = vmul.f32 %v2251_v57, %v2251_v57 }
 0x1b3   :  { %v553_v61 = vpop.f32.mrf.mxu3 }
 0x1b4   :  { %648 = vadd.xlane.f32.xlu2 %v587_v59  ;;  %620 = vadd.xlane.f32.xlu0 %v573_v60  ;;  %v2258_v1 = vadd.f32 %v2105_v18, %v553_v61 }
 0x1b6   :  { %v1789_v63 = vpop.eup %1788  ;;  %v588_v7 = vmul.f32 %v2258_v1, %v2258_v1 }
 0x1b7   :  { %v655_v2 = vmul.f32 %v1789_v63, %v591_v55  ;;  %v593_v3 = vpop.xlane.xlu0 %592 }
 0x1b8   :  { %1790 = vrsqrt.f32 %v593_v3  ;;  %vm673_vm2 = vcmp.eq.f32.partialorder %v593_v3, inf  ;;  %v676_v61 = vand.u32 2147483648, %v593_v3  ;;  %vm675_vm3 = vcmp.eq.f32.partialorder %v593_v3, 0.0 }
 0x1b9   :  { %v656_v5 = vmul.f32 %v1789_v63, %v655_v2 }
 0x1bb   :  { %v657_v8 = vmul.f32 0.5, %v656_v5  ;;  %v555_v9 = vpop.f32.mrf.mxu3  ;;  %v2262_v11 = vpop.xlane.xlu1 %622 }
 0x1bc   :  { %v2265_v13 = vadd.f32 %v2105_v18, %v555_v9  ;;  %1792 = vrsqrt.f32 %v2262_v11  ;;  %650 = vadd.xlane.f32.xlu0 %v588_v7  ;;  %vm853_vm4 = vcmp.eq.f32.partialorder %v2262_v11, inf  ;;  %vm855_vm5 = vcmp.eq.f32.partialorder %v2262_v11, 0.0 }
 0x1bd   :  { %v658_v14 = vsub.f32 1.5, %v657_v8 }
 0x1be   :  { %v1791_v15 = vpop.eup %1790  ;;  %v589_v17 = vmul.f32 %v2265_v13, %v2265_v13 }
 0x1bf   :  { %v659_v21 = vmul.f32 %v1789_v63, %v658_v14  ;;  %v667_v22 = vmul.f32 %v1791_v15, %v593_v3 }
 0x1c0   :  { %652 = vadd.xlane.f32.xlu1 %v589_v17 }
 0x1c1   :  { %v660_v23 = vmul.f32 %v659_v21, %v591_v55  ;;  %v668_v26 = vmul.f32 %v1791_v15, %v667_v22 }
 0x1c2   :  { %v1793_v29 = vpop.eup %1792 }
 0x1c3   :  { %v662_v32 = vsel %vm661_vm0, %v591_v55, %v660_v23  ;;  %v669_v18 = vmul.f32 0.5, %v668_v26  ;;  %v847_v36 = vmul.f32 %v1793_v29, %v2262_v11  ;;  %v2271_v39 = vpop.xlane.xlu2 %624  ;;  %v2273_v40 = vpop.xlane.xlu1 %594 }
 0x1c4   :  { %v665_v42 = vsel %vm663_vm1, %v664_v31, %v662_v32  ;;  %1794 = vrsqrt.f32 %v2271_v39  ;;  %vm865_vm6 = vcmp.eq.f32.partialorder %v2271_v39, inf  ;;  %vm867_vm8 = vcmp.eq.f32.partialorder %v2271_v39, 0.0 }
 0x1c5   :  { %v1038_v45 = vadd.f32 1e-07, %v665_v42  ;;  %v670_v48 = vsub.f32 1.5, %v669_v18  ;;  %v848_v49 = vmul.f32 %v1793_v29, %v847_v36  ;;  %1796 = vrsqrt.f32 %v2273_v40 }
 0x1c6   :  { %vm685_vm10 = vcmp.eq.f32.partialorder %v2273_v40, inf  ;;  %vm687_vm13 = vcmp.eq.f32.partialorder %v2273_v40, 0.0 }
 0x1c7   :  { %1798 = vrcp.f32 %v1038_v45  ;;  %v671_v51 = vmul.f32 %v1791_v15, %v670_v48  ;;  %v849_v54 = vmul.f32 0.5, %v848_v49  ;;  %v1079_v18 = vand.u32 2147483647, %v1038_v45 }
 0x1c8   :  { %v1081_v36 = vand.u32 2147483648, %v1038_v45  ;;  %vm1075_vm9 = vweird.f32 %v1038_v45 }
 0x1c9   :  { %v672_v55 = vmul.f32 %v671_v51, %v593_v3  ;;  %v850_v60 = vsub.f32 1.5, %v849_v54  ;;  %vm1080_vm12 = vcmp.eq.f32.partialorder %v1079_v18, 8.507059e+37 }
 0x1ca   :  { %v1795_v59 = vpop.eup %1794 }
 0x1cb   :  { %v859_v63 = vmul.f32 %v1795_v59, %v2271_v39  ;;  %v2278_v2 = vpop.xlane.xlu1 %596  ;;  %v1797_v5 = vpop.eup %1796  ;;  %v674_v7 = vsel %vm673_vm2, %v593_v3, %v672_v55  ;;  %v851_v8 = vmul.f32 %v1793_v29, %v850_v60  ;;  %v856_v3 = vand.u32 2147483648, %v2262_v11 }
 0x1cc   :  { %1800 = vrsqrt.f32 %v2278_v2  ;;  %v2281_v9 = vpop.xlane.xlu0 %626  ;;  %v677_v15 = vsel %vm675_vm3, %v676_v61, %v674_v7  ;;  %v679_v21 = vmul.f32 %v1797_v5, %v2273_v40  ;;  %vm697_vm15 = vcmp.eq.f32.partialorder %v2278_v2, inf }
 0x1cd   :  { %v1799_v14 = vpop.eup %1798  ;;  %v860_v17 = vmul.f32 %v1795_v59, %v859_v63  ;;  %v2285_v23 = vadd.f32 1e-07, %v677_v15  ;;  %v852_v26 = vmul.f32 %v851_v8, %v2262_v11  ;;  %1802 = vrsqrt.f32 %v2281_v9 }
 0x1ce   :  { %v1071_v22 = vmul.f32 %v1799_v14, %v1038_v45  ;;  %v680_v31 = vmul.f32 %v1797_v5, %v679_v21  ;;  %vm1076_vm7 = vweird.f32 %v1799_v14  ;;  %v868_v63 = vand.u32 2147483648, %v2271_v39 }
 0x1cf   :  { %v861_v29 = vmul.f32 0.5, %v860_v17  ;;  %1804 = vrcp.f32 %v2285_v23  ;;  %v854_v42 = vsel %vm853_vm4, %v2262_v11, %v852_v26  ;;  %vm1077_vm11 = vmor %vm1075_vm9, %vm1076_vm7  ;;  %v1082_v11 = vor.u32 1.1754944e-38, %v1081_v36 }
 0x1d0   :  { %v1072_v32 = vsub.f32 1.0, %v1071_v22  ;;  %v681_v49 = vmul.f32 0.5, %v680_v31  ;;  %v857_v55 = vsel %vm855_vm5, %v856_v3, %v854_v42  ;;  %v1093_v31 = vand.u32 2147483647, %v2285_v23  ;;  %v2312_v42 = vpop.xlane.xlu2 %598 }
 0x1d1   :  { %v862_v48 = vsub.f32 1.5, %v861_v29  ;;  %v2299_v60 = vadd.f32 1e-07, %v857_v55  ;;  %v1095_v36 = vand.u32 2147483648, %v2285_v23  ;;  %vm699_vm0 = vcmp.eq.f32.partialorder %v2278_v2, 0.0 }
 0x1d2   :  { %v1801_v51 = vpop.eup %1800  ;;  %v1073_v54 = vmul.f32 %v1799_v14, %v1072_v32  ;;  %v682_v7 = vsub.f32 1.5, %v681_v49  ;;  %v688_v32 = vand.u32 2147483648, %v2273_v40  ;;  %vm1089_vm1 = vweird.f32 %v2285_v23 }
 0x1d3   :  { %v863_v61 = vmul.f32 %v1795_v59, %v862_v48  ;;  %v691_v15 = vmul.f32 %v1801_v51, %v2278_v2  ;;  %v2304_v17 = vpop.eup %1802  ;;  %1806 = vrcp.f32 %v2299_v60  ;;  %vm1094_vm2 = vcmp.eq.f32.partialorder %v1093_v31, 8.507059e+37 }
 0x1d4   :  { %v1074_v8 = vadd.f32 %v1799_v14, %v1073_v54  ;;  %v683_v26 = vmul.f32 %v1797_v5, %v682_v7  ;;  %v871_v55 = vmul.f32 %v2304_v17, %v2281_v9  ;;  %1808 = vrsqrt.f32 %v2312_v42 }
 0x1d5   :  { %v1805_v21 = vpop.eup %1804  ;;  %v864_v22 = vmul.f32 %v863_v61, %v2271_v39  ;;  %v692_v3 = vmul.f32 %v1801_v51, %v691_v15  ;;  %vm877_vm4 = vcmp.eq.f32.partialorder %v2281_v9, inf  ;;  %vm1299_vm7 = vweird.f32 %v2299_v60 }
 0x1d6   :  { %v1078_v59 = vsel %vm1077_vm11, %v1799_v14, %v1074_v8  ;;  %v1085_v29 = vmul.f32 %v1805_v21, %v2285_v23  ;;  %v684_v5 = vmul.f32 %v683_v26, %v2273_v40  ;;  %vm1090_vm14 = vweird.f32 %v1805_v21 }
 0x1d7   :  { %v1083_v45 = vsel %vm1080_vm12, %v1082_v11, %v1078_v59  ;;  %v866_v14 = vsel %vm865_vm6, %v2271_v39, %v864_v22  ;;  %v693_v54 = vmul.f32 0.5, %v692_v3  ;;  %v872_v15 = vmul.f32 %v2304_v17, %v871_v55  ;;  %vm1091_vm3 = vmor %vm1089_vm1, %vm1090_vm14 }
 0x1d8   :  { %v1518_v18 = vmul.f32 %v1083_v45, %v2108_v20  ;;  %v1086_v48 = vsub.f32 1.0, %v1085_v29  ;;  %v869_v49 = vsel %vm867_vm8, %v868_v63, %v866_v14  ;;  %v686_v20 = vsel %vm685_vm10, %v2273_v40, %v684_v5 }
 0x1d9   :  { %v2324_v61 = vadd.f32 1e-07, %v869_v49  ;;  %v1807_v7 = vpop.eup %1806  ;;  %v689_v39 = vsel %vm687_vm13, %v688_v32, %v686_v20  ;;  %v694_v63 = vsub.f32 1.5, %v693_v54  ;;  %v700_v59 = vand.u32 2147483648, %v2278_v2  ;;  %v2355_v20 = vpop.xlane.xlu1 %628 }
 0x1da   :  { %1550 = vst [vmem:[#allocation8] sm:$0xff] %v1518_v18  ;;  %v1087_v8 = vmul.f32 %v1805_v21, %v1086_v48  ;;  %v1295_v11 = vmul.f32 %v1807_v7, %v2299_v60  ;;  %v1096_v26 = vor.u32 1.1754944e-38, %v1095_v36  ;;  %v2339_v3 = vadd.f32 1e-07, %v689_v39  ;;  %v2346_v14 = vpop.eup %1808 }
 0x1db   :  { %1810 = vrcp.f32 %v2324_v61  ;;  %v1303_v45 = vand.u32 2147483647, %v2299_v60  ;;  %v695_v29 = vmul.f32 %v1801_v51, %v694_v63  ;;  %v873_v32 = vmul.f32 0.5, %v872_v15 }
 0x1dc   :  { %v1088_v22 = vadd.f32 %v1805_v21, %v1087_v8  ;;  %v1296_v40 = vsub.f32 1.0, %v1295_v11  ;;  %v1305_v23 = vand.u32 2147483648, %v2299_v60  ;;  %1812 = vrcp.f32 %v2339_v3 }
 0x1dd   :  { %vm1300_vm5 = vweird.f32 %v1807_v7  ;;  %vm879_vm6 = vcmp.eq.f32.partialorder %v2281_v9, 0.0  ;;  %v696_v48 = vmul.f32 %v695_v29, %v2278_v2  ;;  %v874_v51 = vsub.f32 1.5, %v873_v32 }
 0x1de   :  { %v1092_v18 = vsel %vm1091_vm3, %v1805_v21, %v1088_v22  ;;  %v1297_v36 = vmul.f32 %v1807_v7, %v1296_v40  ;;  %v880_v21 = vand.u32 2147483648, %v2281_v9  ;;  %vm1304_vm8 = vcmp.eq.f32.partialorder %v1303_v45, 8.507059e+37  ;;  %vm1301_vm9 = vmor %vm1299_vm7, %vm1300_vm5 }
 0x1df   :  { %v1097_v31 = vsel %vm1094_vm2, %v1096_v26, %v1092_v18  ;;  %v703_v55 = vmul.f32 %v2346_v14, %v2312_v42  ;;  %v1306_v8 = vor.u32 1.1754944e-38, %v1305_v23  ;;  %v1319_v39 = vand.u32 2147483648, %v2324_v61  ;;  %v2366_v26 = vpop.xlane.xlu2 %600 }
 0x1e0   :  { %v1519_v5 = vmul.f32 %v1097_v31, %v2113_v33  ;;  %v1298_v54 = vadd.f32 %v1807_v7, %v1297_v36  ;;  %v698_v63 = vsel %vm697_vm15, %v2278_v2, %v696_v48  ;;  %v875_v11 = vmul.f32 %v2304_v17, %v874_v51 }
 0x1e1   :  { %v1811_v49 = vpop.eup %1810  ;;  %v701_v60 = vsel %vm699_vm0, %v700_v59, %v698_v63  ;;  %v704_v22 = vmul.f32 %v2346_v14, %v703_v55  ;;  %1814 = vrsqrt.f32 %v2355_v20  ;;  %vm1313_vm10 = vweird.f32 %v2324_v61 }
 0x1e2   :  { %1551 = vst [vmem:[#allocation8 + $0x8] sm:$0xff] %v1519_v5  ;;  %v1309_v33 = vmul.f32 %v1811_v49, %v2324_v61  ;;  %v1302_v15 = vsel %vm1301_vm9, %v1807_v7, %v1298_v54  ;;  %v1813_v40 = vpop.eup %1812  ;;  %v2368_v32 = vadd.f32 1e-07, %v701_v60  ;;  %v876_v7 = vmul.f32 %v875_v11, %v2281_v9 }
 0x1e3   :  { %v1307_v45 = vsel %vm1304_vm8, %v1306_v8, %v1302_v15  ;;  %v1099_v2 = vmul.f32 %v1813_v40, %v2339_v3  ;;  %vm1314_vm11 = vweird.f32 %v1811_v49  ;;  %v1317_v59 = vand.u32 2147483647, %v2324_v61 }
 0x1e4   :  { %v1310_v29 = vsub.f32 1.0, %v1309_v33  ;;  %v1534_v18 = vmul.f32 %v1307_v45, %v2118_v25  ;;  %1816 = vrcp.f32 %v2368_v32  ;;  %v1320_v23 = vor.u32 1.1754944e-38, %v1319_v39  ;;  %vm1315_vm12 = vmor %vm1313_vm10, %vm1314_vm11 }
 0x1e5   :  { %v1100_v31 = vsub.f32 1.0, %v1099_v2  ;;  %v878_v36 = vsel %vm877_vm4, %v2281_v9, %v876_v7  ;;  %v705_v25 = vmul.f32 0.5, %v704_v22  ;;  %v1107_v48 = vand.u32 2147483647, %v2339_v3 }
 0x1e6   :  { %v1311_v17 = vmul.f32 %v1811_v49, %v1310_v29  ;;  %1566 = vst [vmem:[#allocation8 + $0x80] sm:$0xff] %v1534_v18  ;;  %v1109_v51 = vand.u32 2147483648, %v2339_v3  ;;  %v881_v54 = vsel %vm879_vm6, %v880_v21, %v878_v36  ;;  %vm1104_vm13 = vweird.f32 %v1813_v40 }
 0x1e7   :  { %v1101_v55 = vmul.f32 %v1813_v40, %v1100_v31  ;;  %v2386_v8 = vadd.f32 1e-07, %v881_v54  ;;  %v706_v33 = vsub.f32 1.5, %v705_v25  ;;  %v1815_v39 = vpop.eup %1814  ;;  %vm1318_vm14 = vcmp.eq.f32.partialorder %v1317_v59, 8.507059e+37  ;;  %v2396_v29 = vpop.xlane.xlu2 %630 }
 0x1e8   :  { %v1312_v5 = vadd.f32 %v1811_v49, %v1311_v17  ;;  %1818 = vrsqrt.f32 %v2366_v26  ;;  %vm1103_vm15 = vweird.f32 %v2339_v3  ;;  %v1110_v21 = vor.u32 1.1754944e-38, %v1109_v51 }
 0x1e9   :  { %v1102_v60 = vadd.f32 %v1813_v40, %v1101_v55  ;;  %1820 = vrcp.f32 %v2386_v8  ;;  %vm1105_vm0 = vmor %vm1103_vm15, %vm1104_vm13  ;;  %v707_v11 = vmul.f32 %v2346_v14, %v706_v33  ;;  %vm709_vm1 = vcmp.eq.f32.partialorder %v2312_v42, inf }
 0x1ea   :  { %v1316_v63 = vsel %vm1315_vm12, %v1811_v49, %v1312_v5  ;;  %v1817_v9 = vpop.eup %1816  ;;  %vm1108_vm2 = vcmp.eq.f32.partialorder %v1107_v48, 8.507059e+37  ;;  %v883_v45 = vmul.f32 %v1815_v39, %v2355_v20  ;;  %v1121_v18 = vand.u32 2147483647, %v2368_v32 }
 0x1eb   :  { %v1321_v15 = vsel %vm1318_vm14, %v1320_v23, %v1316_v63  ;;  %v1106_v22 = vsel %vm1105_vm0, %v1813_v40, %v1102_v60  ;;  %v1113_v49 = vmul.f32 %v1817_v9, %v2368_v32  ;;  %vm711_vm3 = vcmp.eq.f32.partialorder %v2312_v42, 0.0 }
 0x1ec   :  { %v1535_v61 = vmul.f32 %v1321_v15, %v2126_v30  ;;  %v1111_v3 = vsel %vm1108_vm2, %v1110_v21, %v1106_v22  ;;  %v708_v30 = vmul.f32 %v707_v11, %v2312_v42  ;;  %v712_v40 = vand.u32 2147483648, %v2312_v42 }
 0x1ed   :  { %v1520_v14 = vmul.f32 %v1111_v3, %v2123_v28  ;;  %v1114_v2 = vsub.f32 1.0, %v1113_v49  ;;  %v884_v7 = vmul.f32 %v1815_v39, %v883_v45  ;;  %vm1118_vm4 = vweird.f32 %v1817_v9 }
 0x1ee   :  { %1567 = vst [vmem:[#allocation8 + $0x88] sm:$0xff] %v1535_v61  ;;  %v1819_v17 = vpop.eup %1818  ;;  %v1123_v59 = vand.u32 2147483648, %v2368_v32  ;;  %v710_v23 = vsel %vm709_vm1, %v2312_v42, %v708_v30  ;;  %1822 = vrsqrt.f32 %v2396_v29  ;;  %vm1117_vm5 = vweird.f32 %v2368_v32  ;;  %v2421_v32 = vpop.xlane.xlu0 %602 }
 0x1ef   :  { %v1821_v31 = vpop.eup %1820  ;;  %1552 = vst [vmem:[#allocation8 + $0x10] sm:$0xff] %v1520_v14  ;;  %v1115_v36 = vmul.f32 %v1817_v9, %v1114_v2  ;;  %v713_v25 = vsel %vm711_vm3, %v712_v40, %v710_v23  ;;  %v885_v5 = vmul.f32 0.5, %v884_v7  ;;  %v715_v28 = vmul.f32 %v1819_v17, %v2366_v26  ;;  %vm1119_vm8 = vmor %vm1117_vm5, %vm1118_vm4 }
 0x1f0   :  { %vm2410_vm6 = vcmp.eq.f32.partialorder %v1121_v18, 8.507059e+37  ;;  %v1323_v51 = vmul.f32 %v1821_v31, %v2386_v8  ;;  %v2415_v54 = vadd.f32 1e-07, %v713_v25  ;;  %vm889_vm7 = vcmp.eq.f32.partialorder %v2355_v20, inf }
 0x1f1   :  { %v1116_v42 = vadd.f32 %v1817_v9, %v1115_v36  ;;  %v886_v55 = vsub.f32 1.5, %v885_v5  ;;  %v716_v33 = vmul.f32 %v1819_v17, %v715_v28  ;;  %v1124_v63 = vor.u32 1.1754944e-38, %v1123_v59 }
 0x1f2   :  { %v1324_v15 = vsub.f32 1.0, %v1323_v51  ;;  %v1331_v60 = vand.u32 2147483647, %v2386_v8  ;;  %1824 = vrcp.f32 %v2415_v54  ;;  %v1333_v21 = vand.u32 2147483648, %v2386_v8 }
 0x1f3   :  { %v1120_v61 = vsel %vm1119_vm8, %v1817_v9, %v1116_v42  ;;  %v887_v11 = vmul.f32 %v1815_v39, %v886_v55  ;;  %v717_v22 = vmul.f32 0.5, %v716_v33  ;;  %vm1328_vm9 = vweird.f32 %v1821_v31  ;;  %v2430_v9 = vpop.xlane.xlu1 %604 }
 0x1f4   :  { %v1823_v49 = vpop.eup %1822  ;;  %v1125_v45 = vsel %vm2410_vm6, %v1124_v63, %v1120_v61  ;;  %v1325_v3 = vmul.f32 %v1821_v31, %v1324_v15  ;;  %vm891_vm10 = vcmp.eq.f32.partialorder %v2355_v20, 0.0  ;;  %v892_v14 = vand.u32 2147483648, %v2355_v20 }
 0x1f5   :  { %v1521_v18 = vmul.f32 %v1125_v45, %v2133_v35  ;;  %v888_v30 = vmul.f32 %v887_v11, %v2355_v20  ;;  %v718_v2 = vsub.f32 1.5, %v717_v22  ;;  %vm1327_vm11 = vweird.f32 %v2386_v8 }
 0x1f6   :  { %v1326_v40 = vadd.f32 %v1821_v31, %v1325_v3  ;;  %v895_v39 = vmul.f32 %v1823_v49, %v2396_v29  ;;  %1826 = vrsqrt.f32 %v2421_v32  ;;  %vm1329_vm12 = vmor %vm1327_vm11, %vm1328_vm9  ;;  %vm1332_vm13 = vcmp.eq.f32.partialorder %v1331_v60, 8.507059e+37  ;;  %v2454_v60 = vpop.xlane.xlu0 %632 }
 0x1f7   :  { %1553 = vst [vmem:[#allocation8 + $0x18] sm:$0xff] %v1521_v18  ;;  %v1334_v7 = vor.u32 1.1754944e-38, %v1333_v21  ;;  %v890_v35 = vsel %vm889_vm7, %v2355_v20, %v888_v30  ;;  %v719_v59 = vmul.f32 %v1819_v17, %v718_v2  ;;  %1828 = vrsqrt.f32 %v2430_v9 }
 0x1f8   :  { %v1825_v23 = vpop.eup %1824  ;;  %v1330_v36 = vsel %vm1329_vm12, %v1821_v31, %v1326_v40  ;;  %v893_v25 = vsel %vm891_vm10, %v892_v14, %v890_v35  ;;  %v896_v5 = vmul.f32 %v1823_v49, %v895_v39  ;;  %vm721_vm14 = vcmp.eq.f32.partialorder %v2366_v26, inf }
 0x1f9   :  { %v1335_v8 = vsel %vm1332_vm13, %v1334_v7, %v1330_v36  ;;  %v1127_v28 = vmul.f32 %v1825_v23, %v2415_v54  ;;  %v2442_v48 = vadd.f32 1e-07, %v893_v25  ;;  %v720_v42 = vmul.f32 %v719_v59, %v2366_v26 }
 0x1fa   :  { %v1536_v51 = vmul.f32 %v1335_v8, %v2136_v37  ;;  %vm723_vm15 = vcmp.eq.f32.partialorder %v2366_v26, 0.0  ;;  %v897_v17 = vmul.f32 0.5, %v896_v5  ;;  %v724_v20 = vand.u32 2147483648, %v2366_v26 }
 0x1fb   :  { %v1128_v31 = vsub.f32 1.0, %v1127_v28  ;;  %1830 = vrcp.f32 %v2442_v48  ;;  %vm901_vm0 = vcmp.eq.f32.partialorder %v2396_v29, inf  ;;  %v1135_v33 = vand.u32 2147483647, %v2415_v54  ;;  %v2475_v28 = vpop.xlane.xlu2 %606 }
 0x1fc   :  { %v1827_v55 = vpop.eup %1826  ;;  %1568 = vst [vmem:[#allocation8 + $0x90] sm:$0xff] %v1536_v51  ;;  %v1137_v63 = vand.u32 2147483648, %v2415_v54  ;;  %v722_v37 = vsel %vm721_vm14, %v2366_v26, %v720_v42  ;;  %v898_v15 = vsub.f32 1.5, %v897_v17  ;;  %vm1132_vm1 = vweird.f32 %v1825_v23 }
 0x1fd   :  { %v1129_v61 = vmul.f32 %v1825_v23, %v1128_v31  ;;  %v725_v21 = vsel %vm723_vm15, %v724_v20, %v722_v37  ;;  %v727_v11 = vmul.f32 %v1827_v55, %v2421_v32  ;;  %v1829_v22 = vpop.eup %1828  ;;  %vm1131_vm2 = vweird.f32 %v2415_v54 }
 0x1fe   :  { %v2458_v45 = vadd.f32 1e-07, %v725_v21  ;;  %v899_v3 = vmul.f32 %v1823_v49, %v898_v15  ;;  %vm903_vm3 = vcmp.eq.f32.partialorder %v2396_v29, 0.0  ;;  %v739_v26 = vmul.f32 %v1829_v22, %v2430_v9  ;;  %vm1133_vm4 = vmor %vm1131_vm2, %vm1132_vm1 }
 0x1ff   :  { %v1130_v18 = vadd.f32 %v1825_v23, %v1129_v61  ;;  %v728_v30 = vmul.f32 %v1827_v55, %v727_v11  ;;  %1832 = vrsqrt.f32 %v2454_v60  ;;  %vm1136_vm5 = vcmp.eq.f32.partialorder %v1135_v33, 8.507059e+37 }
 0x200   :  { %v1138_v14 = vor.u32 1.1754944e-38, %v1137_v63  ;;  %1834 = vrcp.f32 %v2458_v45  ;;  %v904_v2 = vand.u32 2147483648, %v2396_v29  ;;  %v900_v39 = vmul.f32 %v899_v3, %v2396_v29 }
 0x201   :  { %v1831_v40 = vpop.eup %1830  ;;  %v1134_v54 = vsel %vm1133_vm4, %v1825_v23, %v1130_v18  ;;  %v729_v49 = vmul.f32 0.5, %v728_v30  ;;  %vm733_vm6 = vcmp.eq.f32.partialorder %v2421_v32, inf  ;;  %v740_v7 = vmul.f32 %v1829_v22, %v739_v26 }
 0x202   :  { %v1139_v35 = vsel %vm1136_vm5, %v1138_v14, %v1134_v54  ;;  %v1337_v59 = vmul.f32 %v1831_v40, %v2442_v48  ;;  %vm735_vm7 = vcmp.eq.f32.partialorder %v2421_v32, 0.0  ;;  %v736_v36 = vand.u32 2147483648, %v2421_v32 }
 0x203   :  { %v1522_v25 = vmul.f32 %v1139_v35, %v2143_v41  ;;  %v1345_v5 = vand.u32 2147483647, %v2442_v48  ;;  %v902_v23 = vsel %vm901_vm0, %v2396_v29, %v900_v39  ;;  %v730_v8 = vsub.f32 1.5, %v729_v49  ;;  %v2533_v29 = vpop.xlane.xlu1 %634 }
 0x204   :  { %v1338_v51 = vsub.f32 1.0, %v1337_v59  ;;  %v1347_v42 = vand.u32 2147483648, %v2442_v48  ;;  %v905_v17 = vsel %vm903_vm3, %v904_v2, %v902_v23  ;;  %v741_v31 = vmul.f32 0.5, %v740_v7 }
 0x205   :  { %vm745_vm8 = vcmp.eq.f32.partialorder %v2430_v9, inf  ;;  %v2481_v20 = vpop.eup %1832  ;;  %1554 = vst [vmem:[#allocation8 + $0x20] sm:$0xff] %v1522_v25  ;;  %vm1341_vm9 = vweird.f32 %v2442_v48  ;;  %vm1342_vm10 = vweird.f32 %v1831_v40  ;;  %v2484_v41 = vadd.f32 1e-07, %v905_v17 }
 0x206   :  { %v731_v33 = vmul.f32 %v1827_v55, %v730_v8  ;;  %v1835_v63 = vpop.eup %1834  ;;  %v1339_v37 = vmul.f32 %v1831_v40, %v1338_v51  ;;  %v742_v15 = vsub.f32 1.5, %v741_v31  ;;  %v907_v61 = vmul.f32 %v2481_v20, %v2454_v60  ;;  %vm1343_vm13 = vmor %vm1341_vm9, %vm1342_vm10 }
 0x207   :  { %1836 = vrsqrt.f32 %v2475_v28  ;;  %vm2489_vm11 = vcmp.eq.f32.partialorder %v1345_v5, 8.507059e+37  ;;  %v1141_v21 = vmul.f32 %v1835_v63, %v2458_v45  ;;  %vm747_vm12 = vcmp.eq.f32.partialorder %v2430_v9, 0.0 }
 0x208   :  { %1838 = vrcp.f32 %v2484_v41  ;;  %v1340_v11 = vadd.f32 %v1831_v40, %v1339_v37  ;;  %v1348_v55 = vor.u32 1.1754944e-38, %v1347_v42  ;;  %v732_v3 = vmul.f32 %v731_v33, %v2421_v32 }
 0x209   :  { %v748_v18 = vand.u32 2147483648, %v2430_v9  ;;  %v1142_v30 = vsub.f32 1.0, %v1141_v21  ;;  %v1149_v26 = vand.u32 2147483647, %v2458_v45  ;;  %v743_v14 = vmul.f32 %v1829_v22, %v742_v15 }
 0x20a   :  { %v908_v2 = vmul.f32 %v2481_v20, %v907_v61  ;;  %v1344_v54 = vsel %vm1343_vm13, %v1831_v40, %v1340_v11  ;;  %vm1146_vm14 = vweird.f32 %v1835_v63  ;;  %v1151_v39 = vand.u32 2147483648, %v2458_v45 }
 0x20b   :  { %v734_v49 = vsel %vm733_vm6, %v2421_v32, %v732_v3  ;;  %v1349_v7 = vsel %vm2489_vm11, %v1348_v55, %v1344_v54  ;;  %v1143_v35 = vmul.f32 %v1835_v63, %v1142_v30  ;;  %v744_v59 = vmul.f32 %v743_v14, %v2430_v9 }
 0x20c   :  { %v737_v48 = vsel %vm735_vm7, %v736_v36, %v734_v49  ;;  %v1537_v40 = vmul.f32 %v1349_v7, %v2148_v44  ;;  %vm1145_vm15 = vweird.f32 %v2458_v45  ;;  %v909_v5 = vmul.f32 0.5, %v908_v2 }
 0x20d   :  { %v2512_v22 = vpop.eup %1836  ;;  %v2516_v25 = vadd.f32 1e-07, %v737_v48  ;;  %v1144_v8 = vadd.f32 %v1835_v63, %v1143_v35  ;;  %vm1150_vm0 = vcmp.eq.f32.partialorder %v1149_v26, 8.507059e+37  ;;  %v746_v51 = vsel %vm745_vm8, %v2430_v9, %v744_v59  ;;  %vm1147_vm1 = vmor %vm1145_vm15, %vm1146_vm14 }
 0x20e   :  { %v1839_v23 = vpop.eup %1838  ;;  %v751_v32 = vmul.f32 %v2512_v22, %v2475_v28  ;;  %1569 = vst [vmem:[#allocation8 + $0x98] sm:$0xff] %v1537_v40  ;;  %v1152_v36 = vor.u32 1.1754944e-38, %v1151_v39  ;;  %vm913_vm2 = vcmp.eq.f32.partialorder %v2454_v60, inf  ;;  %v1359_v42 = vand.u32 2147483647, %v2484_v41  ;;  %v2563_v40 = vpop.xlane.xlu0 %608 }
 0x20f   :  { %v1351_v44 = vmul.f32 %v1839_v23, %v2484_v41  ;;  %1840 = vrcp.f32 %v2516_v25  ;;  %v1148_v45 = vsel %vm1147_vm1, %v1835_v63, %v1144_v8  ;;  %v1361_v17 = vand.u32 2147483648, %v2484_v41 }
 0x210   :  { %v749_v31 = vsel %vm747_vm12, %v748_v18, %v746_v51  ;;  %v1153_v33 = vsel %vm1150_vm0, %v1152_v36, %v1148_v45  ;;  %v910_v61 = vsub.f32 1.5, %v909_v5  ;;  %vm915_vm3 = vcmp.eq.f32.partialorder %v2454_v60, 0.0 }
 0x211   :  { %v1352_v37 = vsub.f32 1.0, %v1351_v44  ;;  %v2531_v15 = vadd.f32 1e-07, %v749_v31  ;;  %v1523_v21 = vmul.f32 %v1153_v33, %v2153_v47  ;;  %v916_v63 = vand.u32 2147483648, %v2454_v60  ;;  %v2545_v47 = vpop.xlane.xlu2 %636 }
 0x212   :  { %v752_v11 = vmul.f32 %v2512_v22, %v751_v32  ;;  %vm1355_vm4 = vweird.f32 %v2484_v41  ;;  %vm1356_vm5 = vweird.f32 %v1839_v23  ;;  %v1163_v9 = vand.u32 2147483647, %v2516_v25 }
 0x213   :  { %v1353_v55 = vmul.f32 %v1839_v23, %v1352_v37  ;;  %1842 = vrcp.f32 %v2531_v15  ;;  %1555 = vst [vmem:[#allocation8 + $0x28] sm:$0xff] %v1523_v21  ;;  %v911_v3 = vmul.f32 %v2481_v20, %v910_v61  ;;  %vm757_vm6 = vcmp.eq.f32.partialorder %v2475_v28, inf  ;;  %vm1357_vm8 = vmor %vm1355_vm4, %vm1356_vm5 }
 0x214   :  { %v753_v18 = vmul.f32 0.5, %v752_v11  ;;  %1844 = vrsqrt.f32 %v2533_v29  ;;  %vm1360_vm7 = vcmp.eq.f32.partialorder %v1359_v42, 8.507059e+37  ;;  %v1362_v14 = vor.u32 1.1754944e-38, %v1361_v17 }
 0x215   :  { %v1841_v30 = vpop.eup %1840  ;;  %v1354_v26 = vadd.f32 %v1839_v23, %v1353_v55  ;;  %v1165_v2 = vand.u32 2147483648, %v2516_v25  ;;  %v912_v20 = vmul.f32 %v911_v3, %v2454_v60  ;;  %vm759_vm9 = vcmp.eq.f32.partialorder %v2475_v28, 0.0 }
 0x216   :  { %v1155_v54 = vmul.f32 %v1841_v30, %v2516_v25  ;;  %v760_v39 = vand.u32 2147483648, %v2475_v28  ;;  %vm1159_vm10 = vweird.f32 %v2516_v25  ;;  %v754_v7 = vsub.f32 1.5, %v753_v18 }
 0x217   :  { %v1358_v49 = vsel %vm1357_vm8, %v1839_v23, %v1354_v26  ;;  %1846 = vrsqrt.f32 %v2545_v47  ;;  %vm2556_vm11 = vcmp.eq.f32.partialorder %v1163_v9, 8.507059e+37  ;;  %v914_v41 = vsel %vm913_vm2, %v2454_v60, %v912_v20 }
 0x218   :  { %v1363_v35 = vsel %vm1360_vm7, %v1362_v14, %v1358_v49  ;;  %v1156_v48 = vsub.f32 1.0, %v1155_v54  ;;  %v1166_v8 = vor.u32 1.1754944e-38, %v1165_v2  ;;  %v917_v51 = vsel %vm915_vm3, %v916_v63, %v914_v41  ;;  %v2609_v41 = vpop.xlane.xlu1 %610 }
 0x219   :  { %v1843_v5 = vpop.eup %1842  ;;  %v1538_v23 = vmul.f32 %v1363_v35, %v2158_v50  ;;  %v755_v32 = vmul.f32 %v2512_v22, %v754_v7  ;;  %vm1160_vm12 = vweird.f32 %v1841_v30  ;;  %v2570_v42 = vadd.f32 1e-07, %v917_v51 }
 0x21a   :  { %v1845_v36 = vpop.eup %1844  ;;  %v1157_v44 = vmul.f32 %v1841_v30, %v1156_v48  ;;  %v1169_v45 = vmul.f32 %v1843_v5, %v2531_v15  ;;  %v1177_v17 = vand.u32 2147483647, %v2531_v15  ;;  %1848 = vrsqrt.f32 %v2563_v40  ;;  %vm1161_vm14 = vmor %vm1159_vm10, %vm1160_vm12 }
 0x21b   :  { %1570 = vst [vmem:[#allocation8 + $0xa0] sm:$0xff] %v1538_v23  ;;  %v756_v31 = vmul.f32 %v755_v32, %v2475_v28  ;;  %v919_v50 = vmul.f32 %v1845_v36, %v2533_v29  ;;  %vm1173_vm13 = vweird.f32 %v2531_v15  ;;  %1850 = vrcp.f32 %v2570_v42 }
 0x21c   :  { %v1158_v60 = vadd.f32 %v1841_v30, %v1157_v44  ;;  %v1170_v33 = vsub.f32 1.0, %v1169_v45  ;;  %vm1174_vm15 = vweird.f32 %v1843_v5  ;;  %v1179_v37 = vand.u32 2147483648, %v2531_v15 }
 0x21d   :  { %v1847_v22 = vpop.eup %1846  ;;  %v758_v61 = vsel %vm757_vm6, %v2475_v28, %v756_v31  ;;  %v920_v21 = vmul.f32 %v1845_v36, %v919_v50  ;;  %vm2589_vm0 = vcmp.eq.f32.partialorder %v1177_v17, 8.507059e+37  ;;  %vm925_vm1 = vcmp.eq.f32.partialorder %v2533_v29, inf  ;;  %vm1175_vm2 = vmor %vm1173_vm13, %vm1174_vm15 }
 0x21e   :  { %v1162_v63 = vsel %vm1161_vm14, %v1841_v30, %v1158_v60  ;;  %v1171_v11 = vmul.f32 %v1843_v5, %v1170_v33  ;;  %v761_v55 = vsel %vm759_vm9, %v760_v39, %v758_v61  ;;  %v931_v9 = vmul.f32 %v1847_v22, %v2545_v47  ;;  %v2622_v33 = vpop.xlane.xlu0 %638 }
 0x21f   :  { %v1167_v3 = vsel %vm2556_vm11, %v1166_v8, %v1162_v63  ;;  %v2593_v18 = vadd.f32 1e-07, %v761_v55  ;;  %v921_v14 = vmul.f32 0.5, %v920_v21  ;;  %v1180_v54 = vor.u32 1.1754944e-38, %v1179_v37 }
 0x220   :  { %v1524_v26 = vmul.f32 %v1167_v3, %v2161_v52  ;;  %v1172_v30 = vadd.f32 %v1843_v5, %v1171_v11  ;;  %v932_v2 = vmul.f32 %v1847_v22, %v931_v9  ;;  %v1849_v28 = vpop.eup %1848  ;;  %vm927_vm3 = vcmp.eq.f32.partialorder %v2533_v29, 0.0 }
 0x221   :  { %1852 = vrcp.f32 %v2593_v18  ;;  %v928_v20 = vand.u32 2147483648, %v2533_v29  ;;  %v1851_v39 = vpop.eup %1850  ;;  %v922_v7 = vsub.f32 1.5, %v921_v14  ;;  %v763_v35 = vmul.f32 %v1849_v28, %v2563_v40 }
 0x222   :  { %1556 = vst [vmem:[#allocation8 + $0x30] sm:$0xff] %v1524_v26  ;;  %v1176_v49 = vsel %vm1175_vm2, %v1843_v5, %v1172_v30  ;;  %v933_v52 = vmul.f32 0.5, %v932_v2  ;;  %v1365_v15 = vmul.f32 %v1851_v39, %v2570_v42  ;;  %v1373_v59 = vand.u32 2147483647, %v2570_v42 }
 0x223   :  { %v1181_v48 = vsel %vm2589_vm0, %v1180_v54, %v1176_v49  ;;  %vm937_vm4 = vcmp.eq.f32.partialorder %v2545_v47, inf  ;;  %v1375_v8 = vand.u32 2147483648, %v2570_v42  ;;  %v923_v5 = vmul.f32 %v1845_v36, %v922_v7 }
 0x224   :  { %v1525_v23 = vmul.f32 %v1181_v48, %v2171_v58  ;;  %v934_v51 = vsub.f32 1.5, %v933_v52  ;;  %v1366_v32 = vsub.f32 1.0, %v1365_v15  ;;  %vm939_vm5 = vcmp.eq.f32.partialorder %v2545_v47, 0.0 }
 0x225   :  { %v940_v44 = vand.u32 2147483648, %v2545_v47  ;;  %v764_v45 = vmul.f32 %v1849_v28, %v763_v35  ;;  %vm1369_vm6 = vweird.f32 %v2570_v42  ;;  %v924_v17 = vmul.f32 %v923_v5, %v2533_v29 }
 0x226   :  { %1557 = vst [vmem:[#allocation8 + $0x38] sm:$0xff] %v1525_v23  ;;  %v935_v31 = vmul.f32 %v1847_v22, %v934_v51  ;;  %1854 = vrsqrt.f32 %v2609_v41  ;;  %v1367_v58 = vmul.f32 %v1851_v39, %v1366_v32  ;;  %vm1370_vm7 = vweird.f32 %v1851_v39 }
 0x227   :  { %v1853_v50 = vpop.eup %1852  ;;  %vm2618_vm8 = vcmp.eq.f32.partialorder %v1373_v59, 8.507059e+37  ;;  %v765_v60 = vmul.f32 0.5, %v764_v45  ;;  %v1376_v37 = vor.u32 1.1754944e-38, %v1375_v8  ;;  %v926_v21 = vsel %vm925_vm1, %v2533_v29, %v924_v17  ;;  %vm1371_vm9 = vmor %vm1369_vm6, %vm1370_vm7 }
 0x228   :  { %v1183_v61 = vmul.f32 %v1853_v50, %v2593_v18  ;;  %v936_v22 = vmul.f32 %v935_v31, %v2545_v47  ;;  %v1368_v63 = vadd.f32 %v1851_v39, %v1367_v58  ;;  %v1191_v11 = vand.u32 2147483647, %v2593_v18 }
 0x229   :  { %v929_v55 = vsel %vm927_vm3, %v928_v20, %v926_v21  ;;  %v766_v9 = vsub.f32 1.5, %v765_v60  ;;  %1856 = vrsqrt.f32 %v2622_v33  ;;  %v1193_v14 = vand.u32 2147483648, %v2593_v18 }
 0x22a   :  { %v1184_v3 = vsub.f32 1.0, %v1183_v61  ;;  %v2634_v25 = vadd.f32 1e-07, %v929_v55  ;;  %v938_v26 = vsel %vm937_vm4, %v2545_v47, %v936_v22  ;;  %v1372_v30 = vsel %vm1371_vm9, %v1851_v39, %v1368_v63 }
 0x22b   :  { %v941_v29 = vsel %vm939_vm5, %v940_v44, %v938_v26  ;;  %v767_v2 = vmul.f32 %v1849_v28, %v766_v9  ;;  %v1377_v42 = vsel %vm2618_vm8, %v1376_v37, %v1372_v30  ;;  %vm1188_vm10 = vweird.f32 %v1853_v50 }
 0x22c   :  { %v1855_v54 = vpop.eup %1854  ;;  %v1185_v20 = vmul.f32 %v1853_v50, %v1184_v3  ;;  %1858 = vrcp.f32 %v2634_v25  ;;  %v1539_v49 = vmul.f32 %v1377_v42, %v2168_v56  ;;  %v2647_v7 = vadd.f32 1e-07, %v941_v29 }
 0x22d   :  { %vm1187_vm11 = vweird.f32 %v2593_v18  ;;  %v768_v39 = vmul.f32 %v767_v2, %v2563_v40  ;;  %v775_v47 = vmul.f32 %v1855_v54, %v2609_v41  ;;  %v1194_v28 = vor.u32 1.1754944e-38, %v1193_v14  ;;  %v2657_v18 = vpop.xlane.xlu2 %612 }
 0x22e   :  { %v1186_v52 = vadd.f32 %v1853_v50, %v1185_v20  ;;  %1571 = vst [vmem:[#allocation8 + $0xa8] sm:$0xff] %v1539_v49  ;;  %vm1189_vm12 = vmor %vm1187_vm11, %vm1188_vm10  ;;  %1860 = vrcp.f32 %v2647_v7  ;;  %vm769_vm13 = vcmp.eq.f32.partialorder %v2563_v40, inf  ;;  %v772_v35 = vand.u32 2147483648, %v2563_v40 }
 0x22f   :  { %v1857_v48 = vpop.eup %1856  ;;  %vm1192_vm14 = vcmp.eq.f32.partialorder %v1191_v11, 8.507059e+37  ;;  %v770_v15 = vsel %vm769_vm13, %v2563_v40, %v768_v39  ;;  %vm771_vm15 = vcmp.eq.f32.partialorder %v2563_v40, 0.0  ;;  %v776_v8 = vmul.f32 %v1855_v54, %v775_v47  ;;  %v2679_v11 = vpop.xlane.xlu1 %640 }
 0x230   :  { %v1190_v56 = vsel %vm1189_vm12, %v1853_v50, %v1186_v52  ;;  %v773_v23 = vsel %vm771_vm15, %v772_v35, %v770_v15  ;;  %v943_v5 = vmul.f32 %v1857_v48, %v2622_v33  ;;  %v1387_v44 = vand.u32 2147483647, %v2634_v25 }
 0x231   :  { %v1195_v59 = vsel %vm1192_vm14, %v1194_v28, %v1190_v56  ;;  %v2662_v45 = vadd.f32 1e-07, %v773_v23  ;;  %vm781_vm0 = vcmp.eq.f32.partialorder %v2609_v41, inf  ;;  %v777_v31 = vmul.f32 0.5, %v776_v8 }
 0x232   :  { %v1859_v51 = vpop.eup %1858  ;;  %v1526_v32 = vmul.f32 %v1195_v59, %v2181_v0  ;;  %vm783_vm1 = vcmp.eq.f32.partialorder %v2609_v41, 0.0  ;;  %v944_v40 = vmul.f32 %v1857_v48, %v943_v5  ;;  %v1389_v50 = vand.u32 2147483648, %v2634_v25 }
 0x233   :  { %v1379_v17 = vmul.f32 %v1859_v51, %v2634_v25  ;;  %v1401_v58 = vand.u32 2147483647, %v2647_v7  ;;  %1862 = vrcp.f32 %v2662_v45  ;;  %v784_v0 = vand.u32 2147483648, %v2609_v41 }
 0x234   :  { %1558 = vst [vmem:[#allocation8 + $0x40] sm:$0xff] %v1526_v32  ;;  %v1861_v36 = vpop.eup %1860  ;;  %vm1383_vm2 = vweird.f32 %v2634_v25  ;;  %v778_v37 = vsub.f32 1.5, %v777_v31  ;;  %v945_v61 = vmul.f32 0.5, %v944_v40  ;;  %vm949_vm3 = vcmp.eq.f32.partialorder %v2622_v33, inf }
 0x235   :  { %v1380_v60 = vsub.f32 1.0, %v1379_v17  ;;  %vm1384_vm4 = vweird.f32 %v1859_v51  ;;  %vm2673_vm5 = vcmp.eq.f32.partialorder %v1387_v44, 8.507059e+37  ;;  %v1393_v22 = vmul.f32 %v1861_v36, %v2647_v7  ;;  %v2694_v39 = vpop.xlane.xlu2 %642 }
 0x236   :  { %v1403_v63 = vand.u32 2147483648, %v2647_v7  ;;  %v779_v9 = vmul.f32 %v1855_v54, %v778_v37  ;;  %v946_v3 = vsub.f32 1.5, %v945_v61  ;;  %vm951_vm6 = vcmp.eq.f32.partialorder %v2622_v33, 0.0  ;;  %vm1385_vm9 = vmor %vm1383_vm2, %vm1384_vm4  ;;  %v2727_v61 = vpop.xlane.xlu0 %614 }
 0x237   :  { %v1381_v55 = vmul.f32 %v1859_v51, %v1380_v60  ;;  %1864 = vrsqrt.f32 %v2657_v18  ;;  %v1390_v26 = vor.u32 1.1754944e-38, %v1389_v50  ;;  %v1394_v30 = vsub.f32 1.0, %v1393_v22  ;;  %v2738_v14 = vpop.xlane.xlu1 %616 }
 0x238   :  { %vm1397_vm7 = vweird.f32 %v2647_v7  ;;  %vm2684_vm8 = vcmp.eq.f32.partialorder %v1401_v58, 8.507059e+37  ;;  %v780_v2 = vmul.f32 %v779_v9, %v2609_v41  ;;  %v947_v42 = vmul.f32 %v1857_v48, %v946_v3 }
 0x239   :  { %v1382_v29 = vadd.f32 %v1859_v51, %v1381_v55  ;;  %1866 = vrsqrt.f32 %v2679_v11  ;;  %v1863_v54 = vpop.eup %1862  ;;  %v1395_v20 = vmul.f32 %v1861_v36, %v1394_v30  ;;  %vm1398_vm10 = vweird.f32 %v1861_v36 }
 0x23a   :  { %v1404_v49 = vor.u32 1.1754944e-38, %v1403_v63  ;;  %v1205_v52 = vand.u32 2147483647, %v2662_v45  ;;  %v1197_v28 = vmul.f32 %v1863_v54, %v2662_v45  ;;  %v1207_v35 = vand.u32 2147483648, %v2662_v45  ;;  %vm1399_vm11 = vmor %vm1397_vm7, %vm1398_vm10 }
 0x23b   :  { %v1386_v47 = vsel %vm1385_vm9, %v1859_v51, %v1382_v29  ;;  %v782_v48 = vsel %vm781_vm0, %v2609_v41, %v780_v2  ;;  %v1396_v56 = vadd.f32 %v1861_v36, %v1395_v20  ;;  %v948_v59 = vmul.f32 %v947_v42, %v2622_v33 }
 0x23c   :  { %v1391_v25 = vsel %vm2673_vm5, %v1390_v26, %v1386_v47  ;;  %v785_v15 = vsel %vm783_vm1, %v784_v0, %v782_v48  ;;  %v1198_v5 = vsub.f32 1.0, %v1197_v28  ;;  %1868 = vrsqrt.f32 %v2694_v39 }
 0x23d   :  { %v1865_v23 = vpop.eup %1864  ;;  %v1540_v8 = vmul.f32 %v1391_v25, %v2178_v62  ;;  %v2709_v51 = vadd.f32 1e-07, %v785_v15  ;;  %v1400_v32 = vsel %vm1399_vm11, %v1861_v36, %v1396_v56  ;;  %v950_v44 = vsel %vm949_vm3, %v2622_v33, %v948_v59 }
 0x23e   :  { %v952_v41 = vand.u32 2147483648, %v2622_v33  ;;  %v787_v17 = vmul.f32 %v1865_v23, %v2657_v18  ;;  %v1405_v62 = vsel %vm2684_vm8, %v1404_v49, %v1400_v32  ;;  %v1199_v7 = vmul.f32 %v1863_v54, %v1198_v5 }
 0x23f   :  { %v1867_v31 = vpop.eup %1866  ;;  %1572 = vst [vmem:[#allocation8 + $0xb0] sm:$0xff] %v1540_v8  ;;  %vm1202_vm12 = vweird.f32 %v1863_v54  ;;  %1870 = vrcp.f32 %v2709_v51  ;;  %v1541_v40 = vmul.f32 %v1405_v62, %v2188_v4  ;;  %vm1201_vm13 = vweird.f32 %v2662_v45 }
 0x240   :  { %v953_v50 = vsel %vm951_vm6, %v952_v41, %v950_v44  ;;  %v1200_v58 = vadd.f32 %v1863_v54, %v1199_v7  ;;  %v788_v36 = vmul.f32 %v1865_v23, %v787_v17  ;;  %v955_v60 = vmul.f32 %v1867_v31, %v2679_v11  ;;  %vm1203_vm14 = vmor %vm1201_vm13, %vm1202_vm12 }
 0x241   :  { %v2724_v0 = vadd.f32 1e-07, %v953_v50  ;;  %1573 = vst [vmem:[#allocation8 + $0xb8] sm:$0xff] %v1541_v40  ;;  %vm1206_vm15 = vcmp.eq.f32.partialorder %v1205_v52, 8.507059e+37  ;;  %v1208_v37 = vor.u32 1.1754944e-38, %v1207_v35  ;;  %vm793_vm0 = vcmp.eq.f32.partialorder %v2657_v18, inf  ;;  %v2762_v40 = vpop.xlane.xlu0 %644 }
 0x242   :  { %v1869_v21 = vpop.eup %1868  ;;  %v1204_v22 = vsel %vm1203_vm14, %v1863_v54, %v1200_v58  ;;  %v1219_v4 = vand.u32 2147483647, %v2709_v51  ;;  %v1221_v45 = vand.u32 2147483648, %v2709_v51  ;;  %v789_v63 = vmul.f32 0.5, %v788_v36 }
 0x243   :  { %1872 = vrcp.f32 %v2724_v0  ;;  %v1209_v33 = vsel %vm1206_vm15, %v1208_v37, %v1204_v22  ;;  %vm795_vm1 = vcmp.eq.f32.partialorder %v2657_v18, 0.0  ;;  %v956_v55 = vmul.f32 %v1867_v31, %v955_v60 }
 0x244   :  { %v1527_v3 = vmul.f32 %v1209_v33, %v2191_v6  ;;  %v796_v26 = vand.u32 2147483648, %v2657_v18  ;;  %v967_v30 = vmul.f32 %v1869_v21, %v2694_v39  ;;  %1874 = vrsqrt.f32 %v2727_v61 }
 0x245   :  { %v1871_v9 = vpop.eup %1870  ;;  %v790_v2 = vsub.f32 1.5, %v789_v63  ;;  %vm961_vm2 = vcmp.eq.f32.partialorder %v2679_v11, inf  ;;  %v964_v42 = vand.u32 2147483648, %v2679_v11  ;;  %vm1215_vm3 = vweird.f32 %v2709_v51 }
 0x246   :  { %v1211_v29 = vmul.f32 %v1871_v9, %v2709_v51  ;;  %1559 = vst [vmem:[#allocation8 + $0x48] sm:$0xff] %v1527_v3  ;;  %vm2744_vm4 = vcmp.eq.f32.partialorder %v1219_v4, 8.507059e+37  ;;  %v957_v54 = vmul.f32 0.5, %v956_v55  ;;  %v968_v20 = vmul.f32 %v1869_v21, %v967_v30 }
 0x247   :  { %v1222_v52 = vor.u32 1.1754944e-38, %v1221_v45  ;;  %v791_v47 = vmul.f32 %v1865_v23, %v790_v2  ;;  %vm963_vm5 = vcmp.eq.f32.partialorder %v2679_v11, 0.0  ;;  %vm973_vm6 = vcmp.eq.f32.partialorder %v2694_v39, inf }
 0x248   :  { %v1212_v49 = vsub.f32 1.0, %v1211_v29  ;;  %1876 = vrsqrt.f32 %v2738_v14  ;;  %vm1411_vm7 = vweird.f32 %v2724_v0  ;;  %v958_v35 = vsub.f32 1.5, %v957_v54 }
 0x249   :  { %v1873_v28 = vpop.eup %1872  ;;  %v969_v48 = vmul.f32 0.5, %v968_v20  ;;  %vm975_vm8 = vcmp.eq.f32.partialorder %v2694_v39, 0.0  ;;  %v976_v25 = vand.u32 2147483648, %v2694_v39  ;;  %vm1216_vm9 = vweird.f32 %v1871_v9 }
 0x24a   :  { %v1213_v56 = vmul.f32 %v1871_v9, %v1212_v49  ;;  %v1407_v15 = vmul.f32 %v1873_v28, %v2724_v0  ;;  %v792_v59 = vmul.f32 %v791_v47, %v2657_v18  ;;  %v1875_v23 = vpop.eup %1874  ;;  %v1415_v8 = vand.u32 2147483647, %v2724_v0  ;;  %vm1217_vm10 = vmor %vm1215_vm3, %vm1216_vm9 }
 0x24b   :  { %v1417_v5 = vand.u32 2147483648, %v2724_v0  ;;  %v959_v32 = vmul.f32 %v1867_v31, %v958_v35  ;;  %v970_v44 = vsub.f32 1.5, %v969_v48  ;;  %v799_v7 = vmul.f32 %v1875_v23, %v2727_v61 }
 0x24c   :  { %v1214_v41 = vadd.f32 %v1871_v9, %v1213_v56  ;;  %v1408_v17 = vsub.f32 1.0, %v1407_v15  ;;  %v794_v62 = vsel %vm793_vm0, %v2657_v18, %v792_v59  ;;  %vm1412_vm11 = vweird.f32 %v1873_v28 }
 0x24d   :  { %v797_v50 = vsel %vm795_vm1, %v796_v26, %v794_v62  ;;  %v960_v31 = vmul.f32 %v959_v32, %v2679_v11  ;;  %v971_v58 = vmul.f32 %v1869_v21, %v970_v44  ;;  %v800_v4 = vmul.f32 %v1875_v23, %v799_v7  ;;  %vm1413_vm13 = vmor %vm1411_vm7, %vm1412_vm11 }
 0x24e   :  { %v2769_v36 = vpop.eup %1876  ;;  %v1218_v60 = vsel %vm1217_vm10, %v1871_v9, %v1214_v41  ;;  %v1409_v37 = vmul.f32 %v1873_v28, %v1408_v17  ;;  %v2771_v22 = vadd.f32 1e-07, %v797_v50  ;;  %1878 = vrsqrt.f32 %v2762_v40 }
 0x24f   :  { %v1223_v33 = vsel %vm2744_vm4, %v1222_v52, %v1218_v60  ;;  %v962_v51 = vsel %vm961_vm2, %v2679_v11, %v960_v31  ;;  %v972_v18 = vmul.f32 %v971_v58, %v2694_v39  ;;  %vm1416_vm12 = vcmp.eq.f32.partialorder %v1415_v8, 8.507059e+37 }
 0x250   :  { %v1528_v21 = vmul.f32 %v1223_v33, %v2201_v12  ;;  %v1410_v45 = vadd.f32 %v1873_v28, %v1409_v37  ;;  %1880 = vrcp.f32 %v2771_v22  ;;  %v1418_v63 = vor.u32 1.1754944e-38, %v1417_v5 }
 0x251   :  { %v965_v55 = vsel %vm963_vm5, %v964_v42, %v962_v51  ;;  %v974_v9 = vsel %vm973_vm6, %v2694_v39, %v972_v18  ;;  %v811_v3 = vmul.f32 %v2769_v36, %v2738_v14  ;;  %v801_v0 = vmul.f32 0.5, %v800_v4  ;;  %v2837_v4 = vpop.xlane.xlu1 %646 }
 0x252   :  { %1560 = vst [vmem:[#allocation8 + $0x50] sm:$0xff] %v1528_v21  ;;  %v1414_v12 = vsel %vm1413_vm13, %v1873_v28, %v1410_v45  ;;  %v2792_v26 = vadd.f32 1e-07, %v965_v55  ;;  %v977_v30 = vsel %vm975_vm8, %v976_v25, %v974_v9  ;;  %v1233_v2 = vand.u32 2147483647, %v2771_v22 }
 0x253   :  { %v1419_v29 = vsel %vm1416_vm12, %v1418_v63, %v1414_v12  ;;  %v2797_v11 = vadd.f32 1e-07, %v977_v30  ;;  %v1235_v6 = vand.u32 2147483648, %v2771_v22  ;;  %vm805_vm14 = vcmp.eq.f32.partialorder %v2727_v61, inf }
 0x254   :  { %v1542_v42 = vmul.f32 %v1419_v29, %v2198_v10  ;;  %1882 = vrcp.f32 %v2792_v26  ;;  %v2802_v54 = vpop.eup %1878  ;;  %v802_v20 = vsub.f32 1.5, %v801_v0  ;;  %vm807_vm15 = vcmp.eq.f32.partialorder %v2727_v61, 0.0  ;;  %v2809_v10 = vpop.xlane.xlu2 %618 }
 0x255   :  { %1884 = vrcp.f32 %v2797_v11  ;;  %v808_v49 = vand.u32 2147483648, %v2727_v61  ;;  %v812_v52 = vmul.f32 %v2769_v36, %v811_v3  ;;  %vm1229_vm0 = vweird.f32 %v2771_v22 }
 0x256   :  { %v1881_v39 = vpop.eup %1880  ;;  %1574 = vst [vmem:[#allocation8 + $0xc0] sm:$0xff] %v1542_v42  ;;  %vm2813_vm1 = vcmp.eq.f32.partialorder %v1233_v2, 8.507059e+37  ;;  %v820_v35 = vand.u32 2147483648, %v2738_v14  ;;  %v1236_v48 = vor.u32 1.1754944e-38, %v1235_v6  ;;  %v803_v25 = vmul.f32 %v1875_v23, %v802_v20 }
 0x257   :  { %v1225_v47 = vmul.f32 %v1881_v39, %v2771_v22  ;;  %v813_v56 = vmul.f32 0.5, %v812_v52  ;;  %v979_v15 = vmul.f32 %v2802_v54, %v2762_v40  ;;  %vm1425_vm2 = vweird.f32 %v2792_v26 }
 0x258   :  { %v1429_v8 = vand.u32 2147483647, %v2792_v26  ;;  %v1431_v5 = vand.u32 2147483648, %v2792_v26  ;;  %vm817_vm3 = vcmp.eq.f32.partialorder %v2738_v14, inf  ;;  %1886 = vrsqrt.f32 %v2809_v10 }
 0x259   :  { %v1226_v59 = vsub.f32 1.0, %v1225_v47  ;;  %vm1439_vm4 = vweird.f32 %v2797_v11  ;;  %v804_v23 = vmul.f32 %v803_v25, %v2727_v61  ;;  %v814_v44 = vsub.f32 1.5, %v813_v56 }
 0x25a   :  { %v1883_v32 = vpop.eup %1882  ;;  %vm819_vm5 = vcmp.eq.f32.partialorder %v2738_v14, 0.0  ;;  %v980_v41 = vmul.f32 %v2802_v54, %v979_v15  ;;  %vm1230_vm6 = vweird.f32 %v1881_v39  ;;  %v1443_v50 = vand.u32 2147483647, %v2797_v11 }
 0x25b   :  { %v1885_v17 = vpop.eup %1884  ;;  %v1227_v62 = vmul.f32 %v1881_v39, %v1226_v59  ;;  %v1421_v7 = vmul.f32 %v1883_v32, %v2792_v26  ;;  %v1445_v58 = vand.u32 2147483648, %v2797_v11  ;;  %v806_v60 = vsel %vm805_vm14, %v2727_v61, %v804_v23  ;;  %vm1231_vm7 = vmor %vm1229_vm0, %vm1230_vm6 }
 0x25c   :  { %v1435_v31 = vmul.f32 %v1885_v17, %v2797_v11  ;;  %v815_v37 = vmul.f32 %v2769_v36, %v814_v44  ;;  %v809_v18 = vsel %vm807_vm15, %v808_v49, %v806_v60  ;;  %v981_v21 = vmul.f32 0.5, %v980_v41 }
 0x25d   :  { %v1228_v33 = vadd.f32 %v1881_v39, %v1227_v62  ;;  %v1422_v51 = vsub.f32 1.0, %v1421_v7  ;;  %vm1426_vm8 = vweird.f32 %v1883_v32  ;;  %v2843_v63 = vadd.f32 1e-07, %v809_v18 }
 0x25e   :  { %v1436_v45 = vsub.f32 1.0, %v1435_v31  ;;  %v816_v55 = vmul.f32 %v815_v37, %v2738_v14  ;;  %v2846_v9 = vpop.eup %1886  ;;  %v982_v12 = vsub.f32 1.5, %v981_v21  ;;  %1888 = vrsqrt.f32 %v2837_v4  ;;  %vm1427_vm11 = vmor %vm1425_vm2, %vm1426_vm8 }
 0x25f   :  { %v1232_v36 = vsel %vm1231_vm7, %v1881_v39, %v1228_v33  ;;  %v1423_v3 = vmul.f32 %v1883_v32, %v1422_v51  ;;  %vm1440_vm9 = vweird.f32 %v1885_v17  ;;  %1890 = vrcp.f32 %v2843_v63 }
 0x260   :  { %v1237_v61 = vsel %vm2813_vm1, %v1236_v48, %v1232_v36  ;;  %v1437_v30 = vmul.f32 %v1885_v17, %v1436_v45  ;;  %vm1430_vm10 = vcmp.eq.f32.partialorder %v1429_v8, 8.507059e+37  ;;  %v1432_v29 = vor.u32 1.1754944e-38, %v1431_v5  ;;  %vm1441_vm12 = vmor %vm1439_vm4, %vm1440_vm9 }
 0x261   :  { %v1529_v22 = vmul.f32 %v1237_v61, %v2211_v19  ;;  %v1424_v0 = vadd.f32 %v1883_v32, %v1423_v3  ;;  %v818_v42 = vsel %vm817_vm3, %v2738_v14, %v816_v55  ;;  %v983_v6 = vmul.f32 %v2802_v54, %v982_v12 }
 0x262   :  { %v1438_v2 = vadd.f32 %v1885_v17, %v1437_v30  ;;  %v823_v39 = vmul.f32 %v2846_v9, %v2809_v10  ;;  %vm1444_vm13 = vcmp.eq.f32.partialorder %v1443_v50, 8.507059e+37  ;;  %v1446_v19 = vor.u32 1.1754944e-38, %v1445_v58  ;;  %v2890_v50 = vpop.xlane.xlu0 %620 }
 0x263   :  { %1561 = vst [vmem:[#allocation8 + $0x58] sm:$0xff] %v1529_v22  ;;  %v1428_v20 = vsel %vm1427_vm11, %v1883_v32, %v1424_v0  ;;  %v821_v26 = vsel %vm819_vm5, %v820_v35, %v818_v42  ;;  %v984_v28 = vmul.f32 %v983_v6, %v2762_v40  ;;  %vm985_vm14 = vcmp.eq.f32.partialorder %v2762_v40, inf }
 0x264   :  { %v1433_v49 = vsel %vm1430_vm10, %v1432_v29, %v1428_v20  ;;  %v1442_v52 = vsel %vm1441_vm12, %v1885_v17, %v1438_v2  ;;  %v2866_v47 = vadd.f32 1e-07, %v821_v26  ;;  %v1889_v54 = vpop.eup %1888  ;;  %v824_v56 = vmul.f32 %v2846_v9, %v823_v39 }
 0x265   :  { %v1543_v48 = vmul.f32 %v1433_v49, %v2208_v16  ;;  %v1447_v25 = vsel %vm1444_vm13, %v1446_v19, %v1442_v52  ;;  %v1891_v15 = vpop.eup %1890  ;;  %v988_v14 = vand.u32 2147483648, %v2762_v40  ;;  %v986_v59 = vsel %vm985_vm14, %v2762_v40, %v984_v28  ;;  %v2878_v16 = vpop.xlane.xlu2 %648 }
 0x266   :  { %v1544_v11 = vmul.f32 %v1447_v25, %v2218_v24  ;;  %1892 = vrcp.f32 %v2866_v47  ;;  %v1239_v35 = vmul.f32 %v1891_v15, %v2843_v63  ;;  %vm987_vm15 = vcmp.eq.f32.partialorder %v2762_v40, 0.0 }
 0x267   :  { %1575 = vst [vmem:[#allocation8 + $0xc8] sm:$0xff] %v1543_v48  ;;  %v1247_v8 = vand.u32 2147483647, %v2843_v63  ;;  %v989_v5 = vsel %vm987_vm15, %v988_v14, %v986_v59  ;;  %v825_v24 = vmul.f32 0.5, %v824_v56  ;;  %v991_v32 = vmul.f32 %v1889_v54, %v2837_v4 }
 0x268   :  { %1576 = vst [vmem:[#allocation8 + $0xd0] sm:$0xff] %v1544_v11  ;;  %v1240_v23 = vsub.f32 1.0, %v1239_v35  ;;  %v1249_v44 = vand.u32 2147483648, %v2843_v63  ;;  %v2883_v41 = vadd.f32 1e-07, %v989_v5  ;;  %vm829_vm0 = vcmp.eq.f32.partialorder %v2809_v10, inf }
 0x269   :  { %v826_v17 = vsub.f32 1.5, %v825_v24  ;;  %vm831_vm1 = vcmp.eq.f32.partialorder %v2809_v10, 0.0  ;;  %v992_v40 = vmul.f32 %v1889_v54, %v991_v32  ;;  %1894 = vrsqrt.f32 %v2878_v16 }
 0x26a   :  { %v1241_v62 = vmul.f32 %v1891_v15, %v1240_v23  ;;  %vm1244_vm2 = vweird.f32 %v1891_v15  ;;  %1896 = vrcp.f32 %v2883_v41  ;;  %v832_v7 = vand.u32 2147483648, %v2809_v10  ;;  %v2933_v11 = vpop.xlane.xlu0 %650 }
 0x26b   :  { %vm1243_vm3 = vweird.f32 %v2843_v63  ;;  %vm2893_vm4 = vcmp.eq.f32.partialorder %v1247_v8, 8.507059e+37  ;;  %v827_v60 = vmul.f32 %v2846_v9, %v826_v17  ;;  %v993_v37 = vmul.f32 0.5, %v992_v40  ;;  %v2946_v40 = vpop.xlane.xlu1 %652 }
 0x26c   :  { %v1893_v31 = vpop.eup %1892  ;;  %v1242_v33 = vadd.f32 %v1891_v15, %v1241_v62  ;;  %v1250_v51 = vor.u32 1.1754944e-38, %v1249_v44  ;;  %vm997_vm5 = vcmp.eq.f32.partialorder %v2837_v4, inf  ;;  %vm1245_vm6 = vmor %vm1243_vm3, %vm1244_vm2  ;;  %vm1257_vm7 = vweird.f32 %v2866_v47 }
 0x26d   :  { %v1253_v18 = vmul.f32 %v1893_v31, %v2866_v47  ;;  %v1261_v21 = vand.u32 2147483647, %v2866_v47  ;;  %v828_v45 = vmul.f32 %v827_v60, %v2809_v10  ;;  %v994_v63 = vsub.f32 1.5, %v993_v37 }
 0x26e   :  { %v1246_v55 = vsel %vm1245_vm6, %v1891_v15, %v1242_v33  ;;  %v1263_v3 = vand.u32 2147483648, %v2866_v47  ;;  %1898 = vrsqrt.f32 %v2890_v50  ;;  %vm1258_vm8 = vweird.f32 %v1893_v31 }
 0x26f   :  { %v1254_v36 = vsub.f32 1.0, %v1253_v18  ;;  %v1895_v9 = vpop.eup %1894  ;;  %v1251_v12 = vsel %vm2893_vm4, %v1250_v51, %v1246_v55  ;;  %v830_v61 = vsel %vm829_vm0, %v2809_v10, %v828_v45  ;;  %v995_v30 = vmul.f32 %v1889_v54, %v994_v63  ;;  %vm1259_vm11 = vmor %vm1257_vm7, %vm1258_vm8 }
 0x270   :  { %v1897_v22 = vpop.eup %1896  ;;  %v1530_v0 = vmul.f32 %v1251_v12, %v2221_v27  ;;  %v833_v2 = vsel %vm831_vm1, %v832_v7, %v830_v61  ;;  %v1003_v42 = vmul.f32 %v1895_v9, %v2878_v16  ;;  %vm2914_vm9 = vcmp.eq.f32.partialorder %v1261_v21, 8.507059e+37 }
 0x271   :  { %v1255_v29 = vmul.f32 %v1893_v31, %v1254_v36  ;;  %v1449_v39 = vmul.f32 %v1897_v22, %v2883_v41  ;;  %v2919_v20 = vadd.f32 1e-07, %v833_v2  ;;  %v996_v19 = vmul.f32 %v995_v30, %v2837_v4 }
 0x272   :  { %1562 = vst [vmem:[#allocation8 + $0x60] sm:$0xff] %v1530_v0  ;;  %v1264_v49 = vor.u32 1.1754944e-38, %v1263_v3  ;;  %vm999_vm10 = vcmp.eq.f32.partialorder %v2837_v4, 0.0  ;;  %v1004_v27 = vmul.f32 %v1895_v9, %v1003_v42  ;;  %v1457_v52 = vand.u32 2147483647, %v2883_v41 }
 0x273   :  { %v1256_v26 = vadd.f32 %v1893_v31, %v1255_v29  ;;  %v1450_v10 = vsub.f32 1.0, %v1449_v39  ;;  %1900 = vrcp.f32 %v2919_v20  ;;  %v1000_v28 = vand.u32 2147483648, %v2837_v4 }
 0x274   :  { %v1899_v54 = vpop.eup %1898  ;;  %v1459_v25 = vand.u32 2147483648, %v2883_v41  ;;  %v998_v56 = vsel %vm997_vm5, %v2837_v4, %v996_v19  ;;  %v1005_v15 = vmul.f32 0.5, %v1004_v27  ;;  %vm1454_vm12 = vweird.f32 %v1897_v22 }
 0x275   :  { %v1260_v48 = vsel %vm1259_vm11, %v1893_v31, %v1256_v26  ;;  %v1451_v14 = vmul.f32 %v1897_v22, %v1450_v10  ;;  %v1001_v35 = vsel %vm999_vm10, %v1000_v28, %v998_v56  ;;  %vm1453_vm13 = vweird.f32 %v2883_v41 }
 0x276   :  { %v1265_v47 = vsel %vm2914_vm9, %v1264_v49, %v1260_v48  ;;  %v2940_v8 = vadd.f32 1e-07, %v1001_v35  ;;  %v1006_v5 = vsub.f32 1.5, %v1005_v15  ;;  %v835_v32 = vmul.f32 %v1899_v54, %v2890_v50  ;;  %vm1455_vm14 = vmor %vm1453_vm13, %vm1454_vm12 }
 0x277   :  { %v1531_v59 = vmul.f32 %v1265_v47, %v2231_v38  ;;  %v1452_v24 = vadd.f32 %v1897_v22, %v1451_v14  ;;  %1902 = vrsqrt.f32 %v2933_v11  ;;  %v1460_v23 = vor.u32 1.1754944e-38, %v1459_v25 }
 0x278   :  { %1904 = vrcp.f32 %v2940_v8  ;;  %vm1458_vm15 = vcmp.eq.f32.partialorder %v1457_v52, 8.507059e+37  ;;  %v1007_v17 = vmul.f32 %v1895_v9, %v1006_v5  ;;  %v836_v38 = vmul.f32 %v1899_v54, %v835_v32 }
 0x279   :  { %1563 = vst [vmem:[#allocation8 + $0x68] sm:$0xff] %v1531_v59  ;;  %v1901_v44 = vpop.eup %1900  ;;  %v1456_v4 = vsel %vm1455_vm14, %v1897_v22, %v1452_v24  ;;  %vm1009_vm0 = vcmp.eq.f32.partialorder %v2878_v16, inf  ;;  %vm1011_vm1 = vcmp.eq.f32.partialorder %v2878_v16, 0.0  ;;  %v1275_v37 = vand.u32 2147483647, %v2919_v20 }
 0x27a   :  { %v1461_v62 = vsel %vm1458_vm15, %v1460_v23, %v1456_v4  ;;  %v1267_v7 = vmul.f32 %v1901_v44, %v2919_v20  ;;  %v1008_v31 = vmul.f32 %v1007_v17, %v2878_v16  ;;  %v837_v58 = vmul.f32 0.5, %v836_v38 }
 0x27b   :  { %v1545_v41 = vmul.f32 %v1461_v62, %v2228_v34  ;;  %v1012_v33 = vand.u32 2147483648, %v2878_v16  ;;  %1906 = vrsqrt.f32 %v2946_v40  ;;  %v1277_v18 = vand.u32 2147483648, %v2919_v20 }
 0x27c   :  { %v1268_v60 = vsub.f32 1.0, %v1267_v7  ;;  %v1010_v21 = vsel %vm1009_vm0, %v2878_v16, %v1008_v31  ;;  %v838_v45 = vsub.f32 1.5, %v837_v58  ;;  %vm841_vm2 = vcmp.eq.f32.partialorder %v2890_v50, inf }
 0x27d   :  { %v1903_v51 = vpop.eup %1902  ;;  %1577 = vst [vmem:[#allocation8 + $0xd8] sm:$0xff] %v1545_v41  ;;  %vm1272_vm3 = vweird.f32 %v1901_v44  ;;  %v1013_v55 = vsel %vm1011_vm1, %v1012_v33, %v1010_v21  ;;  %v844_v61 = vand.u32 2147483648, %v2890_v50  ;;  %vm1271_vm4 = vweird.f32 %v2919_v20 }
 0x27e   :  { %v1905_v34 = vpop.eup %1904  ;;  %v1269_v63 = vmul.f32 %v1901_v44, %v1268_v60  ;;  %v1015_v36 = vmul.f32 %v1903_v51, %v2933_v11  ;;  %v2961_v9 = vadd.f32 1e-07, %v1013_v55  ;;  %v839_v12 = vmul.f32 %v1899_v54, %v838_v45  ;;  %vm1273_vm6 = vmor %vm1271_vm4, %vm1272_vm3 }
 0x27f   :  { %v1463_v3 = vmul.f32 %v1905_v34, %v2940_v8  ;;  %vm1276_vm5 = vcmp.eq.f32.partialorder %v1275_v37, 8.507059e+37  ;;  %v1278_v22 = vor.u32 1.1754944e-38, %v1277_v18  ;;  %v1471_v29 = vand.u32 2147483647, %v2940_v8 }
 0x280   :  { %v1270_v30 = vadd.f32 %v1901_v44, %v1269_v63  ;;  %v1016_v16 = vmul.f32 %v1903_v51, %v1015_v36  ;;  %1908 = vrcp.f32 %v2961_v9  ;;  %v1473_v6 = vand.u32 2147483648, %v2940_v8 }
 0x281   :  { %v1464_v0 = vsub.f32 1.0, %v1463_v3  ;;  %v1907_v2 = vpop.eup %1906  ;;  %v840_v39 = vmul.f32 %v839_v12, %v2890_v50  ;;  %vm1468_vm7 = vweird.f32 %v1905_v34  ;;  %vm843_vm8 = vcmp.eq.f32.partialorder %v2890_v50, 0.0 }
 0x282   :  { %v1274_v42 = vsel %vm1273_vm6, %v1901_v44, %v1270_v30  ;;  %v1017_v19 = vmul.f32 0.5, %v1016_v16  ;;  %v1027_v20 = vmul.f32 %v1907_v2, %v2946_v40  ;;  %vm1467_vm9 = vweird.f32 %v2940_v8 }
 0x283   :  { %v1279_v26 = vsel %vm1276_vm5, %v1278_v22, %v1274_v42  ;;  %v1465_v49 = vmul.f32 %v1905_v34, %v1464_v0  ;;  %v842_v10 = vsel %vm841_vm2, %v2890_v50, %v840_v39  ;;  %vm1469_vm10 = vmor %vm1467_vm9, %vm1468_vm7  ;;  %v1474_v25 = vor.u32 1.1754944e-38, %v1473_v6 }
 0x284   :  { %v1532_v27 = vmul.f32 %v1279_v26, %v2241_v46  ;;  %v1018_v52 = vsub.f32 1.5, %v1017_v19  ;;  %v845_v54 = vsel %vm843_vm8, %v844_v61, %v842_v10  ;;  %v1028_v48 = vmul.f32 %v1907_v2, %v1027_v20 }
 0x285   :  { %v1466_v28 = vadd.f32 %v1905_v34, %v1465_v49  ;;  %v1053_v56 = vadd.f32 1e-07, %v845_v54  ;;  %vm1472_vm11 = vcmp.eq.f32.partialorder %v1471_v29, 8.507059e+37  ;;  %vm1021_vm12 = vcmp.eq.f32.partialorder %v2933_v11, inf }
 0x286   :  { %1564 = vst [vmem:[#allocation8 + $0x70] sm:$0xff] %v1532_v27  ;;  %v1019_v15 = vmul.f32 %v1903_v51, %v1018_v52  ;;  %v1909_v47 = vpop.eup %1908  ;;  %v1029_v46 = vmul.f32 0.5, %v1028_v48  ;;  %v1485_v32 = vand.u32 2147483647, %v2961_v9  ;;  %v1487_v23 = vand.u32 2147483648, %v2961_v9 }
 0x287   :  { %v1470_v14 = vsel %vm1469_vm10, %v1905_v34, %v1466_v28  ;;  %v1477_v59 = vmul.f32 %v1909_v47, %v2961_v9  ;;  %1910 = vrcp.f32 %v1053_v56  ;;  %vm1023_vm13 = vcmp.eq.f32.partialorder %v2933_v11, 0.0 }
 0x288   :  { %v1475_v35 = vsel %vm1472_vm11, %v1474_v25, %v1470_v14  ;;  %v1020_v8 = vmul.f32 %v1019_v15, %v2933_v11  ;;  %v1030_v24 = vsub.f32 1.5, %v1029_v46  ;;  %v1024_v44 = vand.u32 2147483648, %v2933_v11 }
 0x289   :  { %v1546_v50 = vmul.f32 %v1475_v35, %v2238_v43  ;;  %v1478_v5 = vsub.f32 1.0, %v1477_v59  ;;  %vm1482_vm14 = vweird.f32 %v1909_v47  ;;  %vm1481_vm15 = vweird.f32 %v2961_v9 }
 0x28a   :  { %v1022_v17 = vsel %vm1021_vm12, %v2933_v11, %v1020_v8  ;;  %v1031_v43 = vmul.f32 %v1907_v2, %v1030_v24  ;;  %vm1483_vm0 = vmor %vm1481_vm15, %vm1482_vm14  ;;  %v1488_v58 = vor.u32 1.1754944e-38, %v1487_v23  ;;  %vm1033_vm1 = vcmp.eq.f32.partialorder %v2946_v40, inf }
 0x28b   :  { %1578 = vst [vmem:[#allocation8 + $0xe0] sm:$0xff] %v1546_v50  ;;  %v1479_v4 = vmul.f32 %v1909_v47, %v1478_v5  ;;  %v1025_v38 = vsel %vm1023_vm13, %v1024_v44, %v1022_v17  ;;  %vm1486_vm2 = vcmp.eq.f32.partialorder %v1485_v32, 8.507059e+37  ;;  %v1036_v33 = vand.u32 2147483648, %v2946_v40 }
 0x28c   :  { %v1068_v41 = vadd.f32 1e-07, %v1025_v38  ;;  %v1032_v31 = vmul.f32 %v1031_v43, %v2946_v40  ;;  %vm1035_vm3 = vcmp.eq.f32.partialorder %v2946_v40, 0.0  ;;  %v1291_v45 = vand.u32 2147483648, %v1053_v56 }
 0x28d   :  { %v1911_v62 = vpop.eup %1910  ;;  %v1480_v7 = vadd.f32 %v1909_v47, %v1479_v4  ;;  %v1289_v55 = vand.u32 2147483647, %v1053_v56  ;;  %vm1285_vm5 = vweird.f32 %v1053_v56 }
 0x28e   :  { %v1281_v60 = vmul.f32 %v1911_v62, %v1053_v56  ;;  %1912 = vrcp.f32 %v1068_v41  ;;  %v1034_v18 = vsel %vm1033_vm1, %v2946_v40, %v1032_v31  ;;  %vm1286_vm4 = vweird.f32 %v1911_v62 }
 0x28f   :  { %v1484_v37 = vsel %vm1483_vm0, %v1909_v47, %v1480_v7  ;;  %v1037_v34 = vsel %vm1035_vm3, %v1036_v33, %v1034_v18  ;;  %vm1287_vm6 = vmor %vm1285_vm5, %vm1286_vm4  ;;  %v1292_v12 = vor.u32 1.1754944e-38, %v1291_v45  ;;  %vm1290_vm7 = vcmp.eq.f32.partialorder %v1289_v55, 8.507059e+37 }
 0x290   :  { %v1489_v11 = vsel %vm1486_vm2, %v1488_v58, %v1484_v37  ;;  %v1282_v51 = vsub.f32 1.0, %v1281_v60  ;;  %v1069_v36 = vadd.f32 1e-07, %v1037_v34  ;;  %v1501_v22 = vand.u32 2147483648, %v1068_v41 }
 0x291   :  { %v1547_v21 = vmul.f32 %v1489_v11, %v2248_v53  ;;  %v1499_v2 = vand.u32 2147483647, %v1068_v41  ;;  %vm1495_vm9 = vweird.f32 %v1068_v41 }
 0x292   :  { %v1283_v63 = vmul.f32 %v1911_v62, %v1282_v51  ;;  %1914 = vrcp.f32 %v1069_v36  ;;  %v1502_v39 = vor.u32 1.1754944e-38, %v1501_v22  ;;  %v1515_v49 = vand.u32 2147483648, %v1069_v36 }
 0x293   :  { %1579 = vst [vmem:[#allocation8 + $0xe8] sm:$0xff] %v1547_v21  ;;  %vm1500_vm11 = vcmp.eq.f32.partialorder %v1499_v2, 8.507059e+37  ;;  %vm1509_vm13 = vweird.f32 %v1069_v36 }
 0x294   :  { %v1284_v3 = vadd.f32 %v1911_v62, %v1283_v63  ;;  %v1913_v9 = vpop.eup %1912  ;;  %v1516_v28 = vor.u32 1.1754944e-38, %v1515_v49 }
 0x295   :  { %v1491_v30 = vmul.f32 %v1913_v9, %v1068_v41  ;;  %vm1496_vm8 = vweird.f32 %v1913_v9 }
 0x296   :  { %v1288_v61 = vsel %vm1287_vm6, %v1911_v62, %v1284_v3  ;;  %vm1497_vm10 = vmor %vm1495_vm9, %vm1496_vm8 }
 0x297   :  { %v1293_v16 = vsel %vm1290_vm7, %v1292_v12, %v1288_v61  ;;  %v1492_v53 = vsub.f32 1.0, %v1491_v30 }
 0x298   :  { %v1533_v40 = vmul.f32 %v1293_v16, %v2251_v57  ;;  %v1915_v0 = vpop.eup %1914  ;;  %v1513_v57 = vand.u32 2147483647, %v1069_v36 }
 0x299   :  { %v1493_v29 = vmul.f32 %v1913_v9, %v1492_v53  ;;  %v1505_v42 = vmul.f32 %v1915_v0, %v1069_v36  ;;  %vm1510_vm12 = vweird.f32 %v1915_v0 }
 0x29a   :  { %1565 = vst [vmem:[#allocation8 + $0x78] sm:$0xff] %v1533_v40  ;;  %vm1511_vm14 = vmor %vm1509_vm13, %vm1510_vm12  ;;  %vm1514_vm15 = vcmp.eq.f32.partialorder %v1513_v57, 8.507059e+37 }
 0x29b   :  { %v1494_v6 = vadd.f32 %v1913_v9, %v1493_v29  ;;  %v1506_v19 = vsub.f32 1.0, %v1505_v42 }
 0x29d   :  { %v1498_v26 = vsel %vm1497_vm10, %v1913_v9, %v1494_v6  ;;  %v1507_v27 = vmul.f32 %v1915_v0, %v1506_v19 }
 0x29e   :  { %v1503_v20 = vsel %vm1500_vm11, %v1502_v39, %v1498_v26 }
 0x29f   :  { %v1548_v10 = vmul.f32 %v1503_v20, %v2258_v1  ;;  %v1508_v52 = vadd.f32 %v1915_v0, %v1507_v27 }
 0x2a1   :  { %1580 = vst [vmem:[#allocation8 + $0xf0] sm:$0xff] %v1548_v10  ;;  %v1512_v54 = vsel %vm1511_vm14, %v1915_v0, %v1508_v52 }
 0x2a2   :  { %v1517_v48 = vsel %vm1514_vm15, %v1516_v28, %v1512_v54 }
 0x2a3   :  { %v1549_v25 = vmul.f32 %v1517_v48, %v2265_v13 }
 0x2a5   :  { %1581 = vst [vmem:[#allocation8 + $0xf8] sm:$0xff] %v1549_v25 }
 0x2a6   :  { %1594 = dma.vmem_to_hbm [thread:$0]  %s1587_s10, 4096, %s1589_s13, [#allocation4], %s2024_s14, %s2024_s14, %s2025_s15  }
 0x2a7   :  { %2016 = dma.done.wait [#allocation4], 4096  }
 0x2a8   :  { %2017 = vsyncadd [#allocation4], 4294963200 }
 0x2a9   :  { %1599 = vsyncpa [#allocation3], 1 }
 0x2aa   :  { %1600 = vsyncpa [#allocation6], 1 }
 0x2ab   :  { %1601 = vsyncpa [#allocation4], 1 }

</bundles_post_ra>
